<compile_context>
chip_gen: v6e
topology: v6e:2x2x1
jax: 0.10.0
libtpu: 0.0.40
codegen_flags: <defaults>
</compile_context>

<pallas_src>
import jax
import jax.numpy as jnp
from jax.experimental import pallas as pl
from jax.experimental.pallas import tpu as pltpu


def _round_up(x, m):
    return (x + m - 1) // m * m


def _pick_tiles(rows, cap):
    """Return (tile_rows, padded_rows).

    tile_rows divides padded_rows exactly (no dropped rows), padding waste is
    at most 16*grid rows, and the grid has >=2 steps whenever rows allow so
    megacore sharding / DMA pipelining engage.
    """
    g = pl.cdiv(rows, cap)
    if rows >= 32:
        g = max(g, 2)
    tm = _round_up(pl.cdiv(rows, g), 16)
    return tm, g * tm


_CPARAMS = pltpu.CompilerParams(
    dimension_semantics=("parallel",),
    vmem_limit_bytes=48 * 1024 * 1024,   # fits v7x (64 MiB phys); plenty on v5e/v6e
)


# ----------------------------------------------------------------------------
# Pallas kernels
# ----------------------------------------------------------------------------

def _conv_pool_relu_kernel(a_ref, w_ref, b_ref, o_ref):
    # a_ref: (4, TM, K) bf16 -- im2col rows, leading dim = 2x2 pool phase
    # w_ref: (K, C) bf16 ; b_ref: (1, C) f32 ; o_ref: (TM, C) bf16
    tm = o_ref.shape[0]
    k = a_ref.shape[2]
    a = a_ref[...].reshape(4 * tm, k)            # layout-trivial: tm % 16 == 0
    v = jnp.dot(a, w_ref[...], preferred_element_type=jnp.float32)   # one matmul
    m = jnp.maximum(jnp.maximum(v[0 * tm:1 * tm], v[1 * tm:2 * tm]),
                    jnp.maximum(v[2 * tm:3 * tm], v[3 * tm:4 * tm]))
    o_ref[...] = jnp.maximum(m + b_ref[...], 0.0).astype(o_ref.dtype)


def _mlp_head_kernel(x_ref, w1_ref, b1_ref, w2_ref, lb_ref, o_ref):
    # relu(x @ W1 + b1) @ W2 + logit_bias -> softmax (padded lanes masked to -1e30)
    h = jnp.dot(x_ref[...], w1_ref[...], preferred_element_type=jnp.float32)
    h = jnp.maximum(h + b1_ref[...], 0.0).astype(w2_ref.dtype)
    logits = jnp.dot(h, w2_ref[...], preferred_element_type=jnp.float32) + lb_ref[...]
    mx = jnp.max(logits, axis=-1, keepdims=True)
    e = jnp.exp(logits - mx)
    o_ref[...] = e / jnp.sum(e, axis=-1, keepdims=True)


# ----------------------------------------------------------------------------
# pallas_call wrappers
# ----------------------------------------------------------------------------

def _conv_pool_relu_stage(a4, wmat, bias, cout, tile_rows):
    """a4: (4, R_pad, K) bf16 ; wmat: (K, cout) bf16 ; bias: (1, cout) f32."""
    _, r_pad, k = a4.shape
    cost = pl.CostEstimate(
        flops=2 * 4 * r_pad * k * cout,
        transcendentals=0,
        bytes_accessed=int(a4.size * 2 + wmat.size * 2 + bias.size * 4
                           + r_pad * cout * 2),
    )
    return pl.pallas_call(
        _conv_pool_relu_kernel,
        out_shape=jax.ShapeDtypeStruct((r_pad, cout), jnp.bfloat16),
        grid=(r_pad // tile_rows,),
        in_specs=[
            pl.BlockSpec((4, tile_rows, k), lambda i: (0, i, 0)),
            pl.BlockSpec((k, cout), lambda i: (0, 0)),
            pl.BlockSpec((1, cout), lambda i: (0, 0)),
        ],
        out_specs=pl.BlockSpec((tile_rows, cout), lambda i: (i, 0)),
        compiler_params=_CPARAMS,
        cost_estimate=cost,
    )(a4, wmat, bias)


def _phase_im2col(x_nhwc, out_hw, cin):
    """im2col for a valid 3x3 conv evaluated at the 2x2-pool phase positions.

    Rows ordered (phase=dy*2+dx, b, i, j); cols ordered (kh, kw, cin).
    Result: (4, N*out_hw*out_hw, 9*cin).
    """
    n = x_nhwc.shape[0]
    phases = []
    for dy in range(2):
        for dx in range(2):
            taps = []
            for kh in range(3):
                for kw in range(3):
                    s0, s1 = dy + kh, dx + kw
                    taps.append(
                        x_nhwc[:, s0:s0 + 2 * out_hw:2, s1:s1 + 2 * out_hw:2, :])
            phases.append(jnp.concatenate(taps, axis=-1))  # (N, out, out, 9*cin)
    a = jnp.stack(phases, axis=0)                           # (4, N, out, out, 9*cin)
    return a.reshape(4, n * out_hw * out_hw, 9 * cin)


# ----------------------------------------------------------------------------
# Full forward pass (mirrors Cnn.forward, eval semantics)
# ----------------------------------------------------------------------------

def cnn_forward(x_nchw, params):
    f32, bf16 = jnp.float32, jnp.bfloat16
    n = x_nchw.shape[0]

    # ---- stage 1: conv1 + maxpool(2) + relu (fused) --------------------------
    x_nhwc = jnp.transpose(x_nchw, (0, 2, 3, 1)).astype(f32)        # (N,28,28,1)
    a1 = _phase_im2col(x_nhwc, out_hw=13, cin=1)                    # (4, N*169, 9)
    rows1 = n * 169
    tm1, rpad1 = _pick_tiles(rows1, 4096)
    a1 = jnp.pad(a1, ((0, 0), (0, rpad1 - rows1), (0, 16 - 9))).astype(bf16)
    w1 = jnp.pad(params["w1"].reshape(32, 9).T, ((0, 16 - 9), (0, 0))).astype(bf16)
    b1 = params["b1"].reshape(1, 32).astype(f32)
    p1 = _conv_pool_relu_stage(a1, w1, b1, 32, tm1)                 # (rpad1, 32) bf16
    p1 = p1[:rows1].reshape(n, 13, 13, 32)

    # ---- stage 2: conv2 + maxpool(2) + relu (fused, cout padded to 128) ------
    # TODO(synk): conv2_drop (Dropout2d) is identity in eval mode.
    a2 = _phase_im2col(p1, out_hw=5, cin=32)                        # (4, N*25, 288)
    rows2 = n * 25
    tm2, rpad2 = _pick_tiles(rows2, 2048)
    a2 = jnp.pad(a2, ((0, 0), (0, rpad2 - rows2), (0, 0))).astype(bf16)
    # zero-pad cout 64 -> 128: unmasked (lane-dense) output stores, and the
    # fc1 input becomes 128-lane dense (3200 = 25 * 128).
    w2 = jnp.transpose(params["w2"], (2, 3, 1, 0)).reshape(288, 64)
    w2 = jnp.pad(w2, ((0, 0), (0, 64))).astype(bf16)                # (288, 128)
    b2 = jnp.pad(params["b2"], (0, 64)).reshape(1, 128).astype(f32)
    p2 = _conv_pool_relu_stage(a2, w2, b2, 128, tm2)                # (rpad2, 128) bf16
    feats = p2[:rows2].reshape(n, 25 * 128)                         # NHWC(c128) flatten

    # ---- stage 3: fc1 + relu + fc2 + softmax (fused, lane-padded to 128) -----
    # TODO(synk): fc1_drop (Dropout) is identity in eval mode.
    tb, npad = _pick_tiles(n, 1024)                                 # npad % tb == 0
    feats = jnp.pad(feats, ((0, npad - n), (0, 0)))
    # permute fc1 rows to the (h, w, c128) flatten order produced above
    w1p = jnp.transpose(params["fw1"].reshape(100, 64, 5, 5), (2, 3, 1, 0))  # (5,5,64,100)
    w1p = jnp.pad(w1p, ((0, 0), (0, 0), (0, 64), (0, 28)))                   # (5,5,128,128)
    w1p = w1p.reshape(3200, 128).astype(bf16)
    b1p = jnp.pad(params["fb1"], (0, 28)).reshape(1, 128).astype(f32)
    w2p = jnp.pad(params["fw2"].T, ((0, 28), (0, 118))).astype(bf16)         # (128,128)
    lbias = jnp.concatenate(
        [params["fb2"].astype(f32), jnp.full((118,), -1e30, dtype=f32)]
    ).reshape(1, 128)

    cost3 = pl.CostEstimate(
        flops=2 * npad * 3200 * 128 + 2 * npad * 128 * 128,
        transcendentals=npad * 128,
        bytes_accessed=int(npad * 3200 * 2 + 3200 * 128 * 2 + 128 * 128 * 2
                           + npad * 128 * 4),
    )
    out = pl.pallas_call(
        _mlp_head_kernel,
        out_shape=jax.ShapeDtypeStruct((npad, 128), jnp.float32),
        grid=(npad // tb,),
        in_specs=[
            pl.BlockSpec((tb, 3200), lambda i: (i, 0)),
            pl.BlockSpec((3200, 128), lambda i: (0, 0)),
            pl.BlockSpec((1, 128), lambda i: (0, 0)),
            pl.BlockSpec((128, 128), lambda i: (0, 0)),
            pl.BlockSpec((1, 128), lambda i: (0, 0)),
        ],
        out_specs=pl.BlockSpec((tb, 128), lambda i: (i, 0)),
        compiler_params=_CPARAMS,
        cost_estimate=cost3,
    )(feats, w1p, b1p, w2p, lbias)
    return out[:n, :10]


def init_params(key):
    ks = jax.random.split(key, 8)

    def norm(k, shape, scale):
        return scale * jax.random.normal(k, shape, dtype=jnp.float32)

    return {
        "w1": norm(ks[0], (32, 1, 3, 3), 1.0 / (9 ** 0.5)),
        "b1": norm(ks[1], (32,), 0.01),
        "w2": norm(ks[2], (64, 32, 3, 3), 1.0 / (288 ** 0.5)),
        "b2": norm(ks[3], (64,), 0.01),
        "fw1": norm(ks[4], (100, 1600), 1.0 / (1600 ** 0.5)),
        "fb1": norm(ks[5], (100,), 0.01),
        "fw2": norm(ks[6], (10, 100), 1.0 / (100 ** 0.5)),
        "fb2": norm(ks[7], (10,), 0.01),
    }


if __name__ == "__main__":
    key = jax.random.PRNGKey(0)
    kx, kp = jax.random.split(key)
    # 28x28 single-channel input is required by fc1 (64*5*5 == 1600); batch = 2.
    x = jax.random.normal(kx, (2, 1, 28, 28), dtype=jnp.float32)
    params = init_params(kp)

    fwd = jax.jit(cnn_forward)
    out = jax.block_until_ready(fwd(x, params))

    assert out.shape == (2, 10), out.shape
    row_sums = jnp.sum(out, axis=-1)
    assert bool(jnp.all(jnp.abs(row_sums - 1.0) < 1e-4)), row_sums
    print("KERNEL_OK")
</pallas_src>

<mosaic_0001>
module attributes {stable_mosaic.version = 11 : i64} {
  func.func @_conv_pool_relu_kernel(%arg0: i32, %arg1: memref<4x176x16xbf16, #tpu.memory_space<vmem>>, %arg2: memref<16x32xbf16, #tpu.memory_space<vmem>>, %arg3: memref<1x32xf32, #tpu.memory_space<vmem>>, %arg4: memref<176x32xbf16, #tpu.memory_space<vmem>>) attributes {dimension_semantics = [#tpu.dimension_semantics<parallel>], iteration_bounds = array<i64: 2>, scalar_prefetch = 0 : i64, scratch_operands = 0 : i64, tpu.core_type = #tpu.core_type<tc>, window_params = [{transform_indices = @transform_0, window_bounds = array<i64: 4, 176, 16>}, {pipeline_mode = #tpu.pipeline_mode<synchronous>, transform_indices = @transform_1, window_bounds = array<i64: 16, 32>}, {pipeline_mode = #tpu.pipeline_mode<synchronous>, transform_indices = @transform_2, window_bounds = array<i64: 1, 32>}, {transform_indices = @transform_3, window_bounds = array<i64: 176, 32>}]} {
    %c0 = arith.constant 0 : index
    %c0_0 = arith.constant 0 : index
    %c0_1 = arith.constant 0 : index
    %0 = vector.load %arg1[%c0, %c0_0, %c0_1] : memref<4x176x16xbf16, #tpu.memory_space<vmem>>, vector<4x176x16xbf16>
    %1 = vector.shape_cast %0 : vector<4x176x16xbf16> to vector<704x16xbf16>
    %c0_2 = arith.constant 0 : index
    %c0_3 = arith.constant 0 : index
    %2 = vector.load %arg2[%c0_2, %c0_3] : memref<16x32xbf16, #tpu.memory_space<vmem>>, vector<16x32xbf16>
    %cst = arith.constant dense<0.000000e+00> : vector<704x32xf32>
    %3 = tpu.matmul %1, %2, %cst {dimension_numbers = #tpu.dot_dimension_numbers<[1], [0], [0], [1], [0, 0, 1, 1], [], []>} : vector<704x16xbf16>, vector<16x32xbf16>, vector<704x32xf32> -> vector<704x32xf32>
    %4 = vector.extract_strided_slice %3 {offsets = [0, 0], sizes = [176, 32], strides = [1, 1]} : vector<704x32xf32> to vector<176x32xf32>
    %5 = vector.extract_strided_slice %3 {offsets = [176, 0], sizes = [176, 32], strides = [1, 1]} : vector<704x32xf32> to vector<176x32xf32>
    %6 = arith.maximumf %4, %5 : vector<176x32xf32>
    %7 = vector.extract_strided_slice %3 {offsets = [352, 0], sizes = [176, 32], strides = [1, 1]} : vector<704x32xf32> to vector<176x32xf32>
    %8 = vector.extract_strided_slice %3 {offsets = [528, 0], sizes = [176, 32], strides = [1, 1]} : vector<704x32xf32> to vector<176x32xf32>
    %9 = arith.maximumf %7, %8 : vector<176x32xf32>
    %10 = arith.maximumf %6, %9 : vector<176x32xf32>
    %c0_4 = arith.constant 0 : index
    %c0_5 = arith.constant 0 : index
    %11 = vector.load %arg3[%c0_4, %c0_5] : memref<1x32xf32, #tpu.memory_space<vmem>>, vector<1x32xf32>
    %12 = vector.broadcast %11 : vector<1x32xf32> to vector<176x32xf32>
    %13 = arith.addf %10, %12 : vector<176x32xf32>
    %cst_6 = arith.constant 0.000000e+00 : f32
    %14 = vector.broadcast %cst_6 : f32 to vector<176x32xf32>
    %15 = arith.maximumf %13, %14 : vector<176x32xf32>
    %16 = arith.truncf %15 : vector<176x32xf32> to vector<176x32xbf16>
    %c0_7 = arith.constant 0 : index
    %c0_8 = arith.constant 0 : index
    %17 = vector.load %arg4[%c0_7, %c0_8] : memref<176x32xbf16, #tpu.memory_space<vmem>>, vector<176x32xbf16>
    tpu.vector_store %arg4[%c0_7, %c0_8], %16 {strides = array<i32>} : memref<176x32xbf16, #tpu.memory_space<vmem>>, vector<176x32xbf16>,
    return
  }
  func.func @transform_0(%arg0: i32) -> (i32, i32, i32) {
    %c0_i32 = arith.constant 0 : i32
    %c0_i32_0 = arith.constant 0 : i32
    %c0_i32_1 = arith.constant 0 : i32
    return %c0_i32, %arg0, %c0_i32_0 : i32, i32, i32
  }
  func.func @transform_1(%arg0: i32) -> (i32, i32) {
    %c0_i32 = arith.constant 0 : i32
    %c0_i32_0 = arith.constant 0 : i32
    %c0_i32_1 = arith.constant 0 : i32
    return %c0_i32, %c0_i32_0 : i32, i32
  }
  func.func @transform_2(%arg0: i32) -> (i32, i32) {
    %c0_i32 = arith.constant 0 : i32
    %c0_i32_0 = arith.constant 0 : i32
    %c0_i32_1 = arith.constant 0 : i32
    return %c0_i32, %c0_i32_0 : i32, i32
  }
  func.func @transform_3(%arg0: i32) -> (i32, i32) {
    %c0_i32 = arith.constant 0 : i32
    %c0_i32_0 = arith.constant 0 : i32
    return %arg0, %c0_i32 : i32, i32
  }
}

module attributes {stable_mosaic.version = 11 : i64} {
  func.func @_conv_pool_relu_kernel(%arg0: i32, %arg1: memref<4x32x288xbf16, #tpu.memory_space<vmem>>, %arg2: memref<288x128xbf16, #tpu.memory_space<vmem>>, %arg3: memref<1x128xf32, #tpu.memory_space<vmem>>, %arg4: memref<32x128xbf16, #tpu.memory_space<vmem>>) attributes {dimension_semantics = [#tpu.dimension_semantics<parallel>], iteration_bounds = array<i64: 2>, scalar_prefetch = 0 : i64, scratch_operands = 0 : i64, tpu.core_type = #tpu.core_type<tc>, window_params = [{transform_indices = @transform_0, window_bounds = array<i64: 4, 32, 288>}, {pipeline_mode = #tpu.pipeline_mode<synchronous>, transform_indices = @transform_1, window_bounds = array<i64: 288, 128>}, {pipeline_mode = #tpu.pipeline_mode<synchronous>, transform_indices = @transform_2, window_bounds = array<i64: 1, 128>}, {transform_indices = @transform_3, window_bounds = array<i64: 32, 128>}]} {
    %c0 = arith.constant 0 : index
    %c0_0 = arith.constant 0 : index
    %c0_1 = arith.constant 0 : index
    %0 = vector.load %arg1[%c0, %c0_0, %c0_1] : memref<4x32x288xbf16, #tpu.memory_space<vmem>>, vector<4x32x288xbf16>
    %1 = vector.shape_cast %0 : vector<4x32x288xbf16> to vector<128x288xbf16>
    %c0_2 = arith.constant 0 : index
    %c0_3 = arith.constant 0 : index
    %2 = vector.load %arg2[%c0_2, %c0_3] : memref<288x128xbf16, #tpu.memory_space<vmem>>, vector<288x128xbf16>
    %cst = arith.constant dense<0.000000e+00> : vector<128x128xf32>
    %3 = tpu.matmul %1, %2, %cst {dimension_numbers = #tpu.dot_dimension_numbers<[1], [0], [0], [1], [0, 0, 1, 1], [], []>} : vector<128x288xbf16>, vector<288x128xbf16>, vector<128x128xf32> -> vector<128x128xf32>
    %4 = vector.extract_strided_slice %3 {offsets = [0, 0], sizes = [32, 128], strides = [1, 1]} : vector<128x128xf32> to vector<32x128xf32>
    %5 = vector.extract_strided_slice %3 {offsets = [32, 0], sizes = [32, 128], strides = [1, 1]} : vector<128x128xf32> to vector<32x128xf32>
    %6 = arith.maximumf %4, %5 : vector<32x128xf32>
    %7 = vector.extract_strided_slice %3 {offsets = [64, 0], sizes = [32, 128], strides = [1, 1]} : vector<128x128xf32> to vector<32x128xf32>
    %8 = vector.extract_strided_slice %3 {offsets = [96, 0], sizes = [32, 128], strides = [1, 1]} : vector<128x128xf32> to vector<32x128xf32>
    %9 = arith.maximumf %7, %8 : vector<32x128xf32>
    %10 = arith.maximumf %6, %9 : vector<32x128xf32>
    %c0_4 = arith.constant 0 : index
    %c0_5 = arith.constant 0 : index
    %11 = vector.load %arg3[%c0_4, %c0_5] : memref<1x128xf32, #tpu.memory_space<vmem>>, vector<1x128xf32>
    %12 = vector.broadcast %11 : vector<1x128xf32> to vector<32x128xf32>
    %13 = arith.addf %10, %12 : vector<32x128xf32>
    %cst_6 = arith.constant 0.000000e+00 : f32
    %14 = vector.broadcast %cst_6 : f32 to vector<32x128xf32>
    %15 = arith.maximumf %13, %14 : vector<32x128xf32>
    %16 = arith.truncf %15 : vector<32x128xf32> to vector<32x128xbf16>
    %c0_7 = arith.constant 0 : index
    %c0_8 = arith.constant 0 : index
    %17 = vector.load %arg4[%c0_7, %c0_8] : memref<32x128xbf16, #tpu.memory_space<vmem>>, vector<32x128xbf16>
    tpu.vector_store %arg4[%c0_7, %c0_8], %16 {strides = array<i32>} : memref<32x128xbf16, #tpu.memory_space<vmem>>, vector<32x128xbf16>,
    return
  }
  func.func @transform_0(%arg0: i32) -> (i32, i32, i32) {
    %c0_i32 = arith.constant 0 : i32
    %c0_i32_0 = arith.constant 0 : i32
    %c0_i32_1 = arith.constant 0 : i32
    return %c0_i32, %arg0, %c0_i32_0 : i32, i32, i32
  }
  func.func @transform_1(%arg0: i32) -> (i32, i32) {
    %c0_i32 = arith.constant 0 : i32
    %c0_i32_0 = arith.constant 0 : i32
    %c0_i32_1 = arith.constant 0 : i32
    return %c0_i32, %c0_i32_0 : i32, i32
  }
  func.func @transform_2(%arg0: i32) -> (i32, i32) {
    %c0_i32 = arith.constant 0 : i32
    %c0_i32_0 = arith.constant 0 : i32
    %c0_i32_1 = arith.constant 0 : i32
    return %c0_i32, %c0_i32_0 : i32, i32
  }
  func.func @transform_3(%arg0: i32) -> (i32, i32) {
    %c0_i32 = arith.constant 0 : i32
    %c0_i32_0 = arith.constant 0 : i32
    return %arg0, %c0_i32 : i32, i32
  }
}

module attributes {stable_mosaic.version = 11 : i64} {
  func.func @_mlp_head_kernel(%arg0: i32, %arg1: memref<16x3200xbf16, #tpu.memory_space<vmem>>, %arg2: memref<3200x128xbf16, #tpu.memory_space<vmem>>, %arg3: memref<1x128xf32, #tpu.memory_space<vmem>>, %arg4: memref<128x128xbf16, #tpu.memory_space<vmem>>, %arg5: memref<1x128xf32, #tpu.memory_space<vmem>>, %arg6: memref<16x128xf32, #tpu.memory_space<vmem>>) attributes {dimension_semantics = [#tpu.dimension_semantics<parallel>], iteration_bounds = array<i64: 1>, scalar_prefetch = 0 : i64, scratch_operands = 0 : i64, tpu.core_type = #tpu.core_type<tc>, window_params = [{transform_indices = @transform_0, window_bounds = array<i64: 16, 3200>}, {pipeline_mode = #tpu.pipeline_mode<synchronous>, transform_indices = @transform_1, window_bounds = array<i64: 3200, 128>}, {pipeline_mode = #tpu.pipeline_mode<synchronous>, transform_indices = @transform_2, window_bounds = array<i64: 1, 128>}, {pipeline_mode = #tpu.pipeline_mode<synchronous>, transform_indices = @transform_3, window_bounds = array<i64: 128, 128>}, {pipeline_mode = #tpu.pipeline_mode<synchronous>, transform_indices = @transform_4, window_bounds = array<i64: 1, 128>}, {transform_indices = @transform_5, window_bounds = array<i64: 16, 128>}]} {
    %c0 = arith.constant 0 : index
    %c0_0 = arith.constant 0 : index
    %0 = vector.load %arg1[%c0, %c0_0] : memref<16x3200xbf16, #tpu.memory_space<vmem>>, vector<16x3200xbf16>
    %c0_1 = arith.constant 0 : index
    %c0_2 = arith.constant 0 : index
    %1 = vector.load %arg2[%c0_1, %c0_2] : memref<3200x128xbf16, #tpu.memory_space<vmem>>, vector<3200x128xbf16>
    %cst = arith.constant dense<0.000000e+00> : vector<16x128xf32>
    %2 = tpu.matmul %0, %1, %cst {dimension_numbers = #tpu.dot_dimension_numbers<[1], [0], [0], [1], [0, 0, 1, 1], [], []>} : vector<16x3200xbf16>, vector<3200x128xbf16>, vector<16x128xf32> -> vector<16x128xf32>
    %c0_3 = arith.constant 0 : index
    %c0_4 = arith.constant 0 : index
    %3 = vector.load %arg3[%c0_3, %c0_4] : memref<1x128xf32, #tpu.memory_space<vmem>>, vector<1x128xf32>
    %4 = vector.broadcast %3 : vector<1x128xf32> to vector<16x128xf32>
    %5 = arith.addf %2, %4 : vector<16x128xf32>
    %cst_5 = arith.constant 0.000000e+00 : f32
    %6 = vector.broadcast %cst_5 : f32 to vector<16x128xf32>
    %7 = arith.maximumf %5, %6 : vector<16x128xf32>
    %8 = arith.truncf %7 : vector<16x128xf32> to vector<16x128xbf16>
    %c0_6 = arith.constant 0 : index
    %c0_7 = arith.constant 0 : index
    %9 = vector.load %arg4[%c0_6, %c0_7] : memref<128x128xbf16, #tpu.memory_space<vmem>>, vector<128x128xbf16>
    %cst_8 = arith.constant dense<0.000000e+00> : vector<16x128xf32>
    %10 = tpu.matmul %8, %9, %cst_8 {dimension_numbers = #tpu.dot_dimension_numbers<[1], [0], [0], [1], [0, 0, 1, 1], [], []>} : vector<16x128xbf16>, vector<128x128xbf16>, vector<16x128xf32> -> vector<16x128xf32>
    %c0_9 = arith.constant 0 : index
    %c0_10 = arith.constant 0 : index
    %11 = vector.load %arg5[%c0_9, %c0_10] : memref<1x128xf32, #tpu.memory_space<vmem>>, vector<1x128xf32>
    %12 = vector.broadcast %11 : vector<1x128xf32> to vector<16x128xf32>
    %13 = arith.addf %10, %12 : vector<16x128xf32>
    %cst_11 = arith.constant dense<0xFF800000> : vector<16xf32>
    %14 = vector.multi_reduction <maximumf>, %13, %cst_11 [1] : vector<16x128xf32> to vector<16xf32>
    %15 = vector.shape_cast %14 : vector<16xf32> to vector<16x1xf32>
    %16 = vector.broadcast %15 : vector<16x1xf32> to vector<16x128xf32>
    %17 = arith.subf %13, %16 : vector<16x128xf32>
    %18 = math.exp %17 : vector<16x128xf32>
    %cst_12 = arith.constant dense<0.000000e+00> : vector<16xf32>
    %19 = vector.multi_reduction <add>, %18, %cst_12 [1] : vector<16x128xf32> to vector<16xf32>
    %20 = vector.shape_cast %19 : vector<16xf32> to vector<16x1xf32>
    %21 = vector.broadcast %20 : vector<16x1xf32> to vector<16x128xf32>
    %22 = arith.divf %18, %21 : vector<16x128xf32>
    %c0_13 = arith.constant 0 : index
    %c0_14 = arith.constant 0 : index
    %23 = vector.load %arg6[%c0_13, %c0_14] : memref<16x128xf32, #tpu.memory_space<vmem>>, vector<16x128xf32>
    tpu.vector_store %arg6[%c0_13, %c0_14], %22 {strides = array<i32>} : memref<16x128xf32, #tpu.memory_space<vmem>>, vector<16x128xf32>,
    return
  }
  func.func @transform_0(%arg0: i32) -> (i32, i32) {
    %c0_i32 = arith.constant 0 : i32
    %c0_i32_0 = arith.constant 0 : i32
    return %arg0, %c0_i32 : i32, i32
  }
  func.func @transform_1(%arg0: i32) -> (i32, i32) {
    %c0_i32 = arith.constant 0 : i32
    %c0_i32_0 = arith.constant 0 : i32
    %c0_i32_1 = arith.constant 0 : i32
    return %c0_i32, %c0_i32_0 : i32, i32
  }
  func.func @transform_2(%arg0: i32) -> (i32, i32) {
    %c0_i32 = arith.constant 0 : i32
    %c0_i32_0 = arith.constant 0 : i32
    %c0_i32_1 = arith.constant 0 : i32
    return %c0_i32, %c0_i32_0 : i32, i32
  }
  func.func @transform_3(%arg0: i32) -> (i32, i32) {
    %c0_i32 = arith.constant 0 : i32
    %c0_i32_0 = arith.constant 0 : i32
    %c0_i32_1 = arith.constant 0 : i32
    return %c0_i32, %c0_i32_0 : i32, i32
  }
  func.func @transform_4(%arg0: i32) -> (i32, i32) {
    %c0_i32 = arith.constant 0 : i32
    %c0_i32_0 = arith.constant 0 : i32
    %c0_i32_1 = arith.constant 0 : i32
    return %c0_i32, %c0_i32_0 : i32, i32
  }
  func.func @transform_5(%arg0: i32) -> (i32, i32) {
    %c0_i32 = arith.constant 0 : i32
    %c0_i32_0 = arith.constant 0 : i32
    return %arg0, %c0_i32 : i32, i32
  }
}

</mosaic_0001>

<bundles_post_ra>
// kernel: cnn_forward.3
= control target key start
LH: loop header
LB: loop body
LE: loop exit
PB: predicated region body
PF: predicated region fallthrough
CT: control target
= control target key end

     0   :  { %s2086_s12 = smov 0   ;;  %s2088_s13 = smov 0   ;;  %s2516_s0 = inlined_call_operand.vmem [shape: bf16[4,352,16], index: 0, kind: input, shape index: {}]   ;;  %s2517_s1 = inlined_call_operand.vmem [shape: bf16[16,32], index: 1, kind: input, shape index: {}]   ;;  %s2518_s2 = inlined_call_operand.vmem [shape: f32[1,32], index: 2, kind: input, shape index: {}]   ;;  %s2519_s3 = inlined_call_operand.vmem [shape: bf16[352,32], index: 3, kind: output, shape index: {}]  }
   0x1   :  { %s2090_s14 = smov 0  }
   0x2 LB: > { %s1690_s15 = sadd.s32 4294967295, %s2064_s14   ;;  %s2103_s16 = sadd.s32 1, %s2064_s14   ;;  %s2064_s14 = sphi %s2090_s14, %s2522_s14   ;;  %s2060_s13 = sphi %s2088_s13, %s2521_s13   ;;  %s2056_s12 = sphi %s2086_s12, %s2520_s12  }
   0x3   : > { %s17_s17 = ssub.s32 %s2064_s14, %s2103_s16  ;;  %s20_s18 = sadd.s32 1, %s2060_s13 }
   0x4   : > { %p18_p0 = scmp.eq.s32.totalorder %s17_s17, 0  ;;  %p27_p1 = scmp.ne.s32.totalorder %s2060_s13, %s2056_s12 }
   0x5   : > { %p28_p2 = scmp.eq.s32.totalorder %s2064_s14, 0  ;;  %p1693_p4 = scmp.ge.s32.totalorder %s2064_s14, 2 }
   0x6   : > { %s2112_s19 = scalar_select %p18_p0, %s2060_s13, %s20_s18  }
   0x7   : > { %p29_p3 = por %p28_p2, %p27_p1  ;;  %127 = sbr.rel (%p1693_p4) target bundleno = 39 (0x27), region = 24 }
   0xc   : > { %130 = sbr.rel (!%p29_p3) target bundleno = 39 (0x27), region = 28  ;;  %s132_s20 = sand.u32 (%p29_p3), 1, %s2060_s13  }
   0xd   : > { %s1811_s21 = smul.u32 (%p29_p3), 88, %s2064_s14 }
   0xe   : > { %s1971_s22 = smul.u32 (%p29_p3), 352, %s132_s20 }
   0xf   : > { %s2120_s25 = scalar_lea.vmem (%p29_p3), %s2516_s0, %s1811_s21 }
  0x10   : > { %v154_v0 = vld [vmem:[%s2120_s25] sm:$0xff] (%p29_p3)   ;;  %v158_v1 = vld [vmem:[%s2120_s25 + $0x8] sm:$0xff] (%p29_p3)   ;;  %v162_v2 = vld [vmem:[%s2120_s25 + $0x10] sm:$0xff] (%p29_p3)   ;;  %s2125_s26 = scalar_lea.vmem (%p29_p3), [#allocation2], %s1971_s22 }
  0x11   : > { %155 = vst [vmem:[%s2125_s26] sm:$0xff] %v154_v0   ;;  %159 = vst [vmem:[%s2125_s26 + $0x8] sm:$0xff] %v158_v1   ;;  %v166_v3 = vld [vmem:[%s2120_s25 + $0x18] sm:$0xff]   ;;  %v170_v4 = vld [vmem:[%s2120_s25 + $0x20] sm:$0xff]  }
  0x12   : > { %163 = vst [vmem:[%s2125_s26 + $0x10] sm:$0xff] %v162_v2   ;;  %v174_v5 = vld [vmem:[%s2120_s25 + $0x28] sm:$0xff]   ;;  %167 = vst [vmem:[%s2125_s26 + $0x18] sm:$0xff] %v166_v3   ;;  %v178_v6 = vld [vmem:[%s2120_s25 + $0x30] sm:$0xff]  }
  0x13   : > { %171 = vst [vmem:[%s2125_s26 + $0x20] sm:$0xff] %v170_v4   ;;  %175 = vst [vmem:[%s2125_s26 + $0x28] sm:$0xff] %v174_v5   ;;  %v182_v7 = vld [vmem:[%s2120_s25 + $0x38] sm:$0xff]   ;;  %v186_v8 = vld [vmem:[%s2120_s25 + $0x40] sm:$0xff]  }
  0x14   : > { %179 = vst [vmem:[%s2125_s26 + $0x30] sm:$0xff] %v178_v6   ;;  %183 = vst [vmem:[%s2125_s26 + $0x38] sm:$0xff] %v182_v7   ;;  %v190_v9 = vld [vmem:[%s2120_s25 + $0x48] sm:$0xff]   ;;  %v194_v10 = vld [vmem:[%s2120_s25 + $0x50] sm:$0xff]  }
  0x15   : > { %187 = vst [vmem:[%s2125_s26 + $0x40] sm:$0xff] %v186_v8   ;;  %v198_v11 = vld [vmem:[%s2120_s25 + $0xb0] sm:$0xff]   ;;  %191 = vst [vmem:[%s2125_s26 + $0x48] sm:$0xff] %v190_v9   ;;  %v202_v12 = vld [vmem:[%s2120_s25 + $0xb8] sm:$0xff]  }
  0x16   : > { %195 = vst [vmem:[%s2125_s26 + $0x50] sm:$0xff] %v194_v10   ;;  %199 = vst [vmem:[%s2125_s26 + $0x58] sm:$0xff] %v198_v11   ;;  %v206_v13 = vld [vmem:[%s2120_s25 + $0xc0] sm:$0xff]   ;;  %v210_v14 = vld [vmem:[%s2120_s25 + $0xc8] sm:$0xff]  }
  0x17   : > { %203 = vst [vmem:[%s2125_s26 + $0x60] sm:$0xff] %v202_v12   ;;  %207 = vst [vmem:[%s2125_s26 + $0x68] sm:$0xff] %v206_v13   ;;  %v214_v15 = vld [vmem:[%s2120_s25 + $0xd0] sm:$0xff]   ;;  %v218_v16 = vld [vmem:[%s2120_s25 + $0xd8] sm:$0xff]  }
  0x18   : > { %211 = vst [vmem:[%s2125_s26 + $0x70] sm:$0xff] %v210_v14   ;;  %v222_v17 = vld [vmem:[%s2120_s25 + $0xe0] sm:$0xff]   ;;  %215 = vst [vmem:[%s2125_s26 + $0x78] sm:$0xff] %v214_v15   ;;  %v226_v18 = vld [vmem:[%s2120_s25 + $0xe8] sm:$0xff]  }
  0x19   : > { %219 = vst [vmem:[%s2125_s26 + $0x80] sm:$0xff] %v218_v16   ;;  %223 = vst [vmem:[%s2125_s26 + $0x88] sm:$0xff] %v222_v17   ;;  %v230_v19 = vld [vmem:[%s2120_s25 + $0xf0] sm:$0xff]   ;;  %v234_v20 = vld [vmem:[%s2120_s25 + $0xf8] sm:$0xff]  }
  0x1a   : > { %227 = vst [vmem:[%s2125_s26 + $0x90] sm:$0xff] %v226_v18   ;;  %231 = vst [vmem:[%s2125_s26 + $0x98] sm:$0xff] %v230_v19   ;;  %v238_v21 = vld [vmem:[%s2120_s25 + $0x100] sm:$0xff]   ;;  %v246_v23 = vld [vmem:[%s2120_s25 + $0x168] sm:$0xff]  }
  0x1b   : > { %235 = vst [vmem:[%s2125_s26 + $0xa0] sm:$0xff] %v234_v20   ;;  %v242_v22 = vld [vmem:[%s2120_s25 + $0x160] sm:$0xff]   ;;  %239 = vst [vmem:[%s2125_s26 + $0xa8] sm:$0xff] %v238_v21   ;;  %v250_v24 = vld [vmem:[%s2120_s25 + $0x170] sm:$0xff]  }
  0x1c   : > { %243 = vst [vmem:[%s2125_s26 + $0xb0] sm:$0xff] %v242_v22   ;;  %247 = vst [vmem:[%s2125_s26 + $0xb8] sm:$0xff] %v246_v23   ;;  %v254_v25 = vld [vmem:[%s2120_s25 + $0x178] sm:$0xff]   ;;  %v258_v26 = vld [vmem:[%s2120_s25 + $0x180] sm:$0xff]  }
  0x1d   : > { %251 = vst [vmem:[%s2125_s26 + $0xc0] sm:$0xff] %v250_v24   ;;  %255 = vst [vmem:[%s2125_s26 + $0xc8] sm:$0xff] %v254_v25   ;;  %v262_v27 = vld [vmem:[%s2120_s25 + $0x188] sm:$0xff]   ;;  %v266_v28 = vld [vmem:[%s2120_s25 + $0x190] sm:$0xff]  }
  0x1e   : > { %259 = vst [vmem:[%s2125_s26 + $0xd0] sm:$0xff] %v258_v26   ;;  %v270_v29 = vld [vmem:[%s2120_s25 + $0x198] sm:$0xff]   ;;  %263 = vst [vmem:[%s2125_s26 + $0xd8] sm:$0xff] %v262_v27   ;;  %v274_v30 = vld [vmem:[%s2120_s25 + $0x1a0] sm:$0xff]  }
  0x1f   : > { %267 = vst [vmem:[%s2125_s26 + $0xe0] sm:$0xff] %v266_v28   ;;  %271 = vst [vmem:[%s2125_s26 + $0xe8] sm:$0xff] %v270_v29   ;;  %v278_v31 = vld [vmem:[%s2120_s25 + $0x1a8] sm:$0xff]   ;;  %v282_v32 = vld [vmem:[%s2120_s25 + $0x1b0] sm:$0xff]  }
  0x20   : > { %275 = vst [vmem:[%s2125_s26 + $0xf0] sm:$0xff] %v274_v30   ;;  %279 = vst [vmem:[%s2125_s26 + $0xf8] sm:$0xff] %v278_v31   ;;  %v286_v33 = vld [vmem:[%s2120_s25 + $0x210] sm:$0xff]   ;;  %v290_v34 = vld [vmem:[%s2120_s25 + $0x218] sm:$0xff]  }
  0x21   : > { %283 = vst [vmem:[%s2125_s26 + $0x100] sm:$0xff] %v282_v32   ;;  %v294_v35 = vld [vmem:[%s2120_s25 + $0x220] sm:$0xff]   ;;  %287 = vst [vmem:[%s2125_s26 + $0x108] sm:$0xff] %v286_v33   ;;  %v298_v36 = vld [vmem:[%s2120_s25 + $0x228] sm:$0xff]  }
  0x22   : > { %291 = vst [vmem:[%s2125_s26 + $0x110] sm:$0xff] %v290_v34   ;;  %295 = vst [vmem:[%s2125_s26 + $0x118] sm:$0xff] %v294_v35   ;;  %v302_v37 = vld [vmem:[%s2120_s25 + $0x230] sm:$0xff]   ;;  %v306_v38 = vld [vmem:[%s2120_s25 + $0x238] sm:$0xff]  }
  0x23   : > { %299 = vst [vmem:[%s2125_s26 + $0x120] sm:$0xff] %v298_v36   ;;  %303 = vst [vmem:[%s2125_s26 + $0x128] sm:$0xff] %v302_v37   ;;  %v310_v39 = vld [vmem:[%s2120_s25 + $0x240] sm:$0xff]   ;;  %v314_v40 = vld [vmem:[%s2120_s25 + $0x248] sm:$0xff]  }
  0x24   : > { %307 = vst [vmem:[%s2125_s26 + $0x130] sm:$0xff] %v306_v38   ;;  %v318_v41 = vld [vmem:[%s2120_s25 + $0x250] sm:$0xff]   ;;  %311 = vst [vmem:[%s2125_s26 + $0x138] sm:$0xff] %v310_v39   ;;  %v322_v42 = vld [vmem:[%s2120_s25 + $0x258] sm:$0xff]  }
  0x25   : > { %315 = vst [vmem:[%s2125_s26 + $0x140] sm:$0xff] %v314_v40   ;;  %319 = vst [vmem:[%s2125_s26 + $0x148] sm:$0xff] %v318_v41   ;;  %v326_v43 = vld [vmem:[%s2120_s25 + $0x260] sm:$0xff]  }
  0x26   : > { %323 = vst [vmem:[%s2125_s26 + $0x150] sm:$0xff] %v322_v42   ;;  %327 = vst [vmem:[%s2125_s26 + $0x158] sm:$0xff] %v326_v43  }
  0x27 PF: > { %p1695_p5 = scmp.ge.s32.totalorder %s2064_s14, 1  ;;  %p528_p6 = scmp.lt.s32.totalorder %s2064_s14, 3 }
  0x29   : > { %p529_p7 = pnand %p1695_p5, %p528_p6 }
  0x2a   : > { %s535_s29 = sand.u32 (!%p529_p7), 1, %s2056_s12   ;;  %s559_s5 = smul.u32 (!%p529_p7), 22, %s1690_s15 }
  0x2b   : > { %532 = sbr.rel (%p529_p7) target bundleno = 344 (0x158), region = 69 }
  0x2c   : > { %s1972_s30 = smul.u32 (!%p529_p7), 352, %s535_s29  ;;  %p560_p8 = scmp.lt.s32.totalorder (!%p529_p7), %s559_s5, 43 }
  0x2e   : > { %s2218_s4 = scalar_lea.vmem (!%p529_p7), [#allocation2], %s1972_s30 }
  0x30   : > { %v1997_v44 = vld [vmem:[%s2517_s1] sm:$0xff]   ;;  %vm882_vm0 = vcmask 130048   ;;  %v1999_v46 = vld [vmem:[%s2218_s4 + $0xb0] sm:$0xff]   ;;  %v2000_v47 = vld [vmem:[%s2218_s4 + $0x8] sm:$0xff]   ;;  %s2524_s5 = smov (!%p560_p8, %s559_s5), 43  ;;  %vm1605_vm1 = vcmask 257024  }
  0x31   : > { %1879 = vmatprep.subr.bf16.mxu0 %v1997_v44  ;;  %1969 = vmatprep.subr.bf16.mxu1 %v1997_v44  ;;  %v1998_v45 = vld [vmem:[%s2218_s4] sm:$0xff]   ;;  %v2001_v48 = vld [vmem:[%s2218_s4 + $0xb8] sm:$0xff]   ;;  %v2002_v49 = vld [vmem:[%s2218_s4 + $0x10] sm:$0xff]   ;;  %s1696_s8 = sshll.u32 %s2524_s5, 2 }
  0x32   : > { %1880 = vmatpush3.bf16.msra.mxu0 %v1997_v44  ;;  %1970 = vmatpush3.bf16.msra.mxu1 %v1997_v44  ;;  %v2003_v50 = vld [vmem:[%s2218_s4 + $0xc0] sm:$0xff]   ;;  %v2004_v51 = vld [vmem:[%s2218_s4 + $0x18] sm:$0xff]   ;;  %v2005_v52 = vld [vmem:[%s2218_s4 + $0xc8] sm:$0xff]   ;;  %s2399_s11 = scalar_lea.vmem %s2519_s3, %s1696_s8 }
  0x33   : > { %1881 = vmatprep.mubr.msk.bf16.mxu0 %vm882_vm0, %v1998_v45  ;;  %1925 = vmatprep.mubr.msk.bf16.mxu1 %vm882_vm0, %v1999_v46  ;;  %v2006_v53 = vld [vmem:[%s2218_s4 + $0x20] sm:$0xff]   ;;  %v2007_v54 = vld [vmem:[%s2218_s4 + $0xd0] sm:$0xff]   ;;  %v2008_v55 = vld [vmem:[%s2218_s4 + $0x28] sm:$0xff]  }
  0x34   : > { %v2009_v56 = vld [vmem:[%s2218_s4 + $0xd8] sm:$0xff]   ;;  %v2010_v57 = vld [vmem:[%s2218_s4 + $0x30] sm:$0xff]   ;;  %v2011_v58 = vld [vmem:[%s2218_s4 + $0xe0] sm:$0xff]  }
  0x35   : > { %1882 = vmatmul.mubr.msk.bf16.vlgmr.msra.gmra.mxu0 %vm882_vm0, %v2000_v47  ;;  %1926 = vmatmul.mubr.msk.bf16.vlgmr.msra.gmra.mxu1 %vm882_vm0, %v2001_v48  ;;  %v2012_v59 = vld [vmem:[%s2218_s4 + $0x38] sm:$0xff]   ;;  %v2013_v60 = vld [vmem:[%s2218_s4 + $0xe8] sm:$0xff]   ;;  %v2014_v61 = vld [vmem:[%s2218_s4 + $0x40] sm:$0xff]  }
  0x36   : > { %1885 = vmatprep.mubr.msk.bf16.mxu0 %vm882_vm0, %v2002_v49  ;;  %1929 = vmatprep.mubr.msk.bf16.mxu1 %vm882_vm0, %v2003_v50  ;;  %v2015_v62 = vld [vmem:[%s2218_s4 + $0xf0] sm:$0xff]   ;;  %v2016_v63 = vld [vmem:[%s2218_s4 + $0x48] sm:$0xff]   ;;  %v2017_v0 = vld [vmem:[%s2218_s4 + $0xf8] sm:$0xff]  }
  0x37   : > { %v2018_v1 = vld [vmem:[%s2218_s4 + $0x50] sm:$0xff]   ;;  %v2019_v2 = vld [vmem:[%s2218_s4 + $0x100] sm:$0xff]   ;;  %v2020_v3 = vld [vmem:[%s2218_s4 + $0x58] sm:$0xff]  }
  0x38   : > { %v2021_v4 = vld [vmem:[%s2218_s4 + $0x108] sm:$0xff]   ;;  %v2022_v5 = vld [vmem:[%s2218_s4 + $0x60] sm:$0xff]   ;;  %v2023_v6 = vld [vmem:[%s2218_s4 + $0x110] sm:$0xff]  }
  0x39   : > { %v2024_v7 = vld [vmem:[%s2218_s4 + $0x68] sm:$0xff]   ;;  %v2025_v8 = vld [vmem:[%s2218_s4 + $0x118] sm:$0xff]   ;;  %v2026_v9 = vld [vmem:[%s2218_s4 + $0x70] sm:$0xff]  }
  0x3a   : > { %v2027_v10 = vld [vmem:[%s2218_s4 + $0x120] sm:$0xff]   ;;  %v2028_v11 = vld [vmem:[%s2218_s4 + $0x78] sm:$0xff]   ;;  %v2029_v12 = vld [vmem:[%s2218_s4 + $0x128] sm:$0xff]  }
  0x3b   : > { %v2030_v13 = vld [vmem:[%s2218_s4 + $0x80] sm:$0xff]   ;;  %v2031_v14 = vld [vmem:[%s2218_s4 + $0x130] sm:$0xff]   ;;  %v2032_v15 = vld [vmem:[%s2218_s4 + $0x88] sm:$0xff]  }
  0x3c   : > { %v2033_v16 = vld [vmem:[%s2218_s4 + $0x138] sm:$0xff]   ;;  %v2034_v17 = vld [vmem:[%s2218_s4 + $0x90] sm:$0xff]   ;;  %v2035_v18 = vld [vmem:[%s2218_s4 + $0x140] sm:$0xff]  }
  0x3d   : > { %1886 = vmatmul.mubr.msk.bf16.gmra.mxu0 %vm882_vm0, %v2004_v51  ;;  %1930 = vmatmul.mubr.msk.bf16.gmra.mxu1 %vm882_vm0, %v2005_v52  ;;  %v2036_v19 = vld [vmem:[%s2218_s4 + $0x98] sm:$0xff]   ;;  %v2037_v20 = vld [vmem:[%s2218_s4 + $0x148] sm:$0xff]   ;;  %v2038_v21 = vld [vmem:[%s2218_s4 + $0xa0] sm:$0xff]  }
  0x3e   : > { %1889 = vmatprep.mubr.msk.bf16.mxu0 %vm882_vm0, %v2006_v53  ;;  %1933 = vmatprep.mubr.msk.bf16.mxu1 %vm882_vm0, %v2007_v54  ;;  %v2039_v22 = vld [vmem:[%s2218_s4 + $0x150] sm:$0xff]   ;;  %v2040_v23 = vld [vmem:[%s2218_s4 + $0xa8] sm:$0xff]   ;;  %v2041_v24 = vld [vmem:[%s2218_s4 + $0x158] sm:$0xff]  }
  0x45   : > { %1890 = vmatmul.mubr.msk.bf16.gmra.mxu0 %vm882_vm0, %v2008_v55  ;;  %1934 = vmatmul.mubr.msk.bf16.gmra.mxu1 %vm882_vm0, %v2009_v56 }
  0x46   : > { %1893 = vmatprep.mubr.msk.bf16.mxu0 %vm882_vm0, %v2010_v57  ;;  %1937 = vmatprep.mubr.msk.bf16.mxu1 %vm882_vm0, %v2011_v58 }
  0x4d   : > { %1894 = vmatmul.mubr.msk.bf16.gmra.mxu0 %vm882_vm0, %v2012_v59  ;;  %1938 = vmatmul.mubr.msk.bf16.gmra.mxu1 %vm882_vm0, %v2013_v60 }
  0x4e   : > { %1897 = vmatprep.mubr.msk.bf16.mxu0 %vm882_vm0, %v2014_v61  ;;  %1941 = vmatprep.mubr.msk.bf16.mxu1 %vm882_vm0, %v2015_v62 }
  0x55   : > { %1898 = vmatmul.mubr.msk.bf16.gmra.mxu0 %vm882_vm0, %v2016_v63  ;;  %1942 = vmatmul.mubr.msk.bf16.gmra.mxu1 %vm882_vm0, %v2017_v0 }
  0x56   : > { %1901 = vmatprep.mubr.msk.bf16.mxu0 %vm882_vm0, %v2018_v1  ;;  %1945 = vmatprep.mubr.msk.bf16.mxu1 %vm882_vm0, %v2019_v2 }
  0x5d   : > { %1902 = vmatmul.mubr.msk.bf16.gmra.mxu0 %vm882_vm0, %v2020_v3  ;;  %1946 = vmatmul.mubr.msk.bf16.gmra.mxu1 %vm882_vm0, %v2021_v4 }
  0x5e   : > { %1905 = vmatprep.mubr.msk.bf16.mxu0 %vm882_vm0, %v2022_v5  ;;  %1949 = vmatprep.mubr.msk.bf16.mxu1 %vm882_vm0, %v2023_v6  ;;  %v2387_v6 = vld [vmem:[%s2518_s2] ss:$0 sm:$0xff] }
  0x65   : > { %1906 = vmatmul.mubr.msk.bf16.gmra.mxu0 %vm882_vm0, %v2024_v7  ;;  %1950 = vmatmul.mubr.msk.bf16.gmra.mxu1 %vm882_vm0, %v2025_v8 }
  0x66   : > { %1909 = vmatprep.mubr.msk.bf16.mxu0 %vm882_vm0, %v2026_v9  ;;  %1953 = vmatprep.mubr.msk.bf16.mxu1 %vm882_vm0, %v2027_v10 }
  0x6d   : > { %1910 = vmatmul.mubr.msk.bf16.gmra.mxu0 %vm882_vm0, %v2028_v11  ;;  %1954 = vmatmul.mubr.msk.bf16.gmra.mxu1 %vm882_vm0, %v2029_v12 }
  0x6e   : > { %1913 = vmatprep.mubr.msk.bf16.mxu0 %vm882_vm0, %v2030_v13  ;;  %1957 = vmatprep.mubr.msk.bf16.mxu1 %vm882_vm0, %v2031_v14 }
  0x75   : > { %1914 = vmatmul.mubr.msk.bf16.gmra.mxu0 %vm882_vm0, %v2032_v15  ;;  %1958 = vmatmul.mubr.msk.bf16.gmra.mxu1 %vm882_vm0, %v2033_v16 }
  0x76   : > { %1917 = vmatprep.mubr.msk.bf16.mxu0 %vm882_vm0, %v2034_v17  ;;  %1961 = vmatprep.mubr.msk.bf16.mxu1 %vm882_vm0, %v2035_v18 }
  0x7d   : > { %1918 = vmatmul.mubr.msk.bf16.gmra.mxu0 %vm882_vm0, %v2036_v19  ;;  %1962 = vmatmul.mubr.msk.bf16.gmra.mxu1 %vm882_vm0, %v2037_v20 }
  0x7e   : > { %1921 = vmatprep.mubr.msk.bf16.mxu0 %vm882_vm0, %v2038_v21  ;;  %1965 = vmatprep.mubr.msk.bf16.mxu1 %vm882_vm0, %v2039_v22 }
  0x85   : > { %1922 = vmatmul.mubr.msk.bf16.gmra.mxu0 %vm882_vm0, %v2040_v23  ;;  %1966 = vmatmul.mubr.msk.bf16.gmra.mxu1 %vm882_vm0, %v2041_v24 }
  0xf5   : > { %v2308_v25 = vpop.f32.mrf.mxu0  ;;  %v2310_v26 = vpop.f32.mrf.mxu1 }
  0xf7   : > { %v1049_v27 = vpop.f32.mrf.mxu0  ;;  %v1225_v28 = vpop.f32.mrf.mxu1 }
  0xf9   : > { %v2312_v29 = vpop.f32.mrf.mxu0  ;;  %v2314_v30 = vpop.f32.mrf.mxu1 }
  0xfb   : > { %v1052_v31 = vpop.f32.mrf.mxu0  ;;  %v1228_v32 = vpop.f32.mrf.mxu1 }
  0xfd   : > { %v2316_v33 = vpop.f32.mrf.mxu0  ;;  %v2318_v34 = vpop.f32.mrf.mxu1 }
  0xff   : > { %v2320_v35 = vpop.f32.mrf.mxu0  ;;  %v2322_v36 = vpop.f32.mrf.mxu1 }
 0x101   : > { %v2324_v37 = vpop.f32.mrf.mxu0  ;;  %v2326_v38 = vpop.f32.mrf.mxu1 }
 0x103   : > { %v2328_v39 = vpop.f32.mrf.mxu0  ;;  %v2330_v40 = vpop.f32.mrf.mxu1 }
 0x105   : > { %v2332_v41 = vpop.f32.mrf.mxu0  ;;  %v2334_v42 = vpop.f32.mrf.mxu1 }
 0x107   : > { %v2336_v43 = vpop.f32.mrf.mxu0  ;;  %v2338_v44 = vpop.f32.mrf.mxu1 }
 0x109   : > { %v2340_v45 = vpop.f32.mrf.mxu0  ;;  %v2342_v46 = vpop.f32.mrf.mxu1 }
 0x10b   : > { %v2344_v47 = vpop.f32.mrf.mxu0  ;;  %v2346_v48 = vpop.f32.mrf.mxu1 }
 0x10d   : > { %v2348_v49 = vpop.f32.mrf.mxu0  ;;  %v2350_v50 = vpop.f32.mrf.mxu1 }
 0x10f   : > { %v2352_v51 = vpop.f32.mrf.mxu0  ;;  %v2354_v52 = vpop.f32.mrf.mxu1 }
 0x111   : > { %v2356_v53 = vpop.f32.mrf.mxu0  ;;  %v2358_v54 = vpop.f32.mrf.mxu1 }
 0x113   : > { %v2360_v55 = vpop.f32.mrf.mxu0  ;;  %v2362_v56 = vpop.f32.mrf.mxu1 }
 0x115   : > { %v2364_v57 = vpop.f32.mrf.mxu0  ;;  %v2366_v58 = vpop.f32.mrf.mxu1 }
 0x117   : > { %v2368_v59 = vpop.f32.mrf.mxu0  ;;  %v2372_v60 = vpop.f32.mrf.mxu1 }
 0x119   : > { %v2374_v61 = vpop.f32.mrf.mxu0  ;;  %v2376_v62 = vpop.f32.mrf.mxu1 }
 0x11b   : > { %v2378_v63 = vpop.f32.mrf.mxu0  ;;  %v2380_v0 = vpop.f32.mrf.mxu1 }
 0x11d   : > { %v1903_v1 = vpop.f32.mrf.mxu0  ;;  %v1947_v3 = vpop.f32.mrf.mxu1 }
 0x11e   : > { %v1400_v2 = vmax.f32 %v1049_v27, %v1903_v1  ;;  %v1422_v4 = vmax.f32 %v1225_v28, %v1947_v3 }
 0x11f   : > { %v2382_v5 = vpop.f32.mrf.mxu0  ;;  %v2389_v7 = vpop.f32.mrf.mxu1 }
 0x120   : > { %v1444_v8 = vmax.f32 %v1400_v2, %v1422_v4 }
 0x121   : > { %v1904_v9 = vpop.f32.mrf.mxu0  ;;  %v1948_v11 = vpop.f32.mrf.mxu1 }
 0x122   : > { %v1401_v10 = vmax.f32 %v1052_v31, %v1904_v9  ;;  %v1473_v12 = vadd.f32 %v2387_v6, %v1444_v8  ;;  %v1423_v13 = vmax.f32 %v1228_v32, %v1948_v11 }
 0x123   : > { %v2392_v14 = vpop.f32.mrf.mxu0  ;;  %v2394_v15 = vpop.f32.mrf.mxu1 }
 0x124   : > { %v1495_v16 = vmax.f32 %v1473_v12, 0.0  ;;  %v1445_v17 = vmax.f32 %v1401_v10, %v1423_v13 }
 0x125   : > { %v1907_v18 = vpop.f32.mrf.mxu0  ;;  %v1951_v20 = vpop.f32.mrf.mxu1 }
 0x126   : > { %v1404_v19 = vmax.f32 %v2320_v35, %v1907_v18  ;;  %v1812_v21 = vpack.c.bf16 %v1495_v16, %v1495_v16  ;;  %v1474_v22 = vadd.f32 %v2387_v6, %v1445_v17  ;;  %v1426_v23 = vmax.f32 %v2322_v36, %v1951_v20 }
 0x127   : > { %v1145_v24 = vpop.f32.mrf.mxu0  ;;  %v1321_v28 = vpop.f32.mrf.mxu1 }
 0x128   : > { %v1402_v27 = vmax.f32 %v2308_v25, %v1145_v24  ;;  %1606 = vst.msk [vmem:[%s2399_s11] sm:$0xf] %vm1605_vm1, %v1812_v21  ;;  %v1496_v31 = vmax.f32 %v1474_v22, 0.0  ;;  %v1448_v32 = vmax.f32 %v1404_v19, %v1426_v23  ;;  %v1424_v1 = vmax.f32 %v2310_v26, %v1321_v28 }
 0x129   : > { %v1908_v2 = vpop.f32.mrf.mxu0  ;;  %v1952_v3 = vpop.f32.mrf.mxu1 }
 0x12a   : > { %v1405_v35 = vmax.f32 %v2328_v39, %v1908_v2  ;;  %v1813_v4 = vpack.c.bf16 %v1496_v31, %v1496_v31  ;;  %v1477_v8 = vadd.f32 %v2387_v6, %v1448_v32  ;;  %v1446_v9 = vmax.f32 %v1402_v27, %v1424_v1 }
 0x12b   : > { %v1427_v36 = vmax.f32 %v2330_v40, %v1952_v3  ;;  %v1148_v10 = vpop.f32.mrf.mxu0  ;;  %v1324_v11 = vpop.f32.mrf.mxu1 }
 0x12c   : > { %v1403_v25 = vmax.f32 %v2312_v29, %v1148_v10  ;;  %1607 = vst.msk [vmem:[%s2399_s11 + $0x4] sm:$0xf] %vm1605_vm1, %v1813_v4  ;;  %v1499_v12 = vmax.f32 %v1477_v8, 0.0  ;;  %v1475_v26 = vadd.f32 %v2387_v6, %v1446_v9  ;;  %v1425_v39 = vmax.f32 %v2314_v30, %v1324_v11 }
 0x12d   : > { %v1449_v13 = vmax.f32 %v1405_v35, %v1427_v36  ;;  %v1911_v16 = vpop.f32.mrf.mxu0  ;;  %v1955_v18 = vpop.f32.mrf.mxu1 }
 0x12e   : > { %v1408_v17 = vmax.f32 %v2336_v43, %v1911_v16  ;;  %v1816_v19 = vpack.c.bf16 %v1499_v12, %v1499_v12  ;;  %v1497_v20 = vmax.f32 %v1475_v26, 0.0  ;;  %v1447_v29 = vmax.f32 %v1403_v25, %v1425_v39 }
 0x12f   : > { %v1478_v40 = vadd.f32 %v2387_v6, %v1449_v13  ;;  %v1161_v21 = vpop.f32.mrf.mxu0  ;;  %v1430_v22 = vmax.f32 %v2338_v44, %v1955_v18  ;;  %v1337_v24 = vpop.f32.mrf.mxu1 }
 0x130   : > { %v1406_v23 = vmax.f32 %v2316_v33, %v1161_v21  ;;  %1610 = vst.msk [vmem:[%s2399_s11 + $0x10] sm:$0xf] %vm1605_vm1, %v1816_v19  ;;  %v1814_v27 = vpack.c.bf16 %v1497_v20, %v1497_v20  ;;  %v1476_v43 = vadd.f32 %v2387_v6, %v1447_v29  ;;  %v1428_v28 = vmax.f32 %v2318_v34, %v1337_v24 }
 0x131   : > { %v1500_v30 = vmax.f32 %v1478_v40, 0.0  ;;  %v1912_v31 = vpop.f32.mrf.mxu0  ;;  %v1452_v32 = vmax.f32 %v1408_v17, %v1430_v22  ;;  %v1956_v2 = vpop.f32.mrf.mxu1 }
 0x132   : > { %v1409_v1 = vmax.f32 %v2344_v47, %v1912_v31  ;;  %1608 = vst.msk [vmem:[%s2399_s11 + $0x8] sm:$0xf] %vm1605_vm1, %v1814_v27  ;;  %v1498_v35 = vmax.f32 %v1476_v43, 0.0  ;;  %v1450_v33 = vmax.f32 %v1406_v23, %v1428_v28  ;;  %v1431_v3 = vmax.f32 %v2346_v48, %v1956_v2 }
 0x133   : > { %v1817_v44 = vpack.c.bf16 %v1500_v30, %v1500_v30  ;;  %v1164_v4 = vpop.f32.mrf.mxu0  ;;  %v1481_v8 = vadd.f32 %v2387_v6, %v1452_v32  ;;  %v1340_v36 = vpop.f32.mrf.mxu1 }
 0x134   : > { %v1407_v9 = vmax.f32 %v2324_v37, %v1164_v4  ;;  %v1815_v34 = vpack.c.bf16 %v1498_v35, %v1498_v35  ;;  %v1479_v47 = vadd.f32 %v2387_v6, %v1450_v33  ;;  %v1453_v10 = vmax.f32 %v1409_v1, %v1431_v3 }
 0x135   : > { %1611 = vst.msk [vmem:[%s2399_s11 + $0x14] sm:$0xf] %vm1605_vm1, %v1817_v44  ;;  %v1429_v25 = vmax.f32 %v2326_v38, %v1340_v36  ;;  %v1915_v11 = vpop.f32.mrf.mxu0  ;;  %v1503_v12 = vmax.f32 %v1481_v8, 0.0  ;;  %v1959_v48 = vpop.f32.mrf.mxu1 }
 0x136   : > { %v1412_v26 = vmax.f32 %v2352_v51, %v1915_v11  ;;  %1609 = vst.msk [vmem:[%s2399_s11 + $0xc] sm:$0xf] %vm1605_vm1, %v1815_v34  ;;  %v1501_v13 = vmax.f32 %v1479_v47, 0.0  ;;  %v1482_v37 = vadd.f32 %v2387_v6, %v1453_v10  ;;  %v1434_v16 = vmax.f32 %v2354_v52, %v1959_v48 }
 0x137   : > { %v1451_v39 = vmax.f32 %v1407_v9, %v1429_v25  ;;  %v1177_v17 = vpop.f32.mrf.mxu0  ;;  %v1820_v18 = vpack.c.bf16 %v1503_v12, %v1503_v12  ;;  %v1353_v38 = vpop.f32.mrf.mxu1 }
 0x138   : > { %v1410_v19 = vmax.f32 %v2332_v41, %v1177_v17  ;;  %v1818_v20 = vpack.c.bf16 %v1501_v13, %v1501_v13  ;;  %v1504_v40 = vmax.f32 %v1482_v37, 0.0  ;;  %v1456_v29 = vmax.f32 %v1412_v26, %v1434_v16 }
 0x139   : > { %v1480_v51 = vadd.f32 %v2387_v6, %v1451_v39  ;;  %v1916_v21 = vpop.f32.mrf.mxu0  ;;  %1614 = vst.msk [vmem:[%s2399_s11 + $0x20] sm:$0xf] %vm1605_vm1, %v1820_v18  ;;  %v1432_v22 = vmax.f32 %v2334_v42, %v1353_v38  ;;  %v1960_v24 = vpop.f32.mrf.mxu1 }
 0x13a   : > { %v1413_v23 = vmax.f32 %v2360_v55, %v1916_v21  ;;  %1612 = vst.msk [vmem:[%s2399_s11 + $0x18] sm:$0xf] %vm1605_vm1, %v1818_v20  ;;  %v1821_v52 = vpack.c.bf16 %v1504_v40, %v1504_v40  ;;  %v1485_v41 = vadd.f32 %v2387_v6, %v1456_v29  ;;  %v1435_v30 = vmax.f32 %v2362_v56, %v1960_v24 }
 0x13b   : > { %v1502_v27 = vmax.f32 %v1480_v51, 0.0  ;;  %v1180_v43 = vpop.f32.mrf.mxu0  ;;  %v1454_v28 = vmax.f32 %v1410_v19, %v1432_v22  ;;  %v1356_v32 = vpop.f32.mrf.mxu1 }
 0x13c   : > { %v1411_v31 = vmax.f32 %v2340_v45, %v1180_v43  ;;  %1615 = vst.msk [vmem:[%s2399_s11 + $0x24] sm:$0xf] %vm1605_vm1, %v1821_v52  ;;  %v1507_v1 = vmax.f32 %v1485_v41, 0.0  ;;  %v1457_v55 = vmax.f32 %v1413_v23, %v1435_v30  ;;  %v1433_v2 = vmax.f32 %v2342_v46, %v1356_v32 }
 0x13d   : > { %v1819_v42 = vpack.c.bf16 %v1502_v27, %v1502_v27  ;;  %v1919_v44 = vpop.f32.mrf.mxu0  ;;  %v1483_v35 = vadd.f32 %v2387_v6, %v1454_v28  ;;  %v1963_v3 = vpop.f32.mrf.mxu1 }
 0x13e   : > { %v1416_v33 = vmax.f32 %v2368_v59, %v1919_v44  ;;  %v1824_v56 = vpack.c.bf16 %v1507_v1, %v1507_v1  ;;  %v1486_v45 = vadd.f32 %v2387_v6, %v1457_v55  ;;  %v1455_v4 = vmax.f32 %v1411_v31, %v1433_v2 }
 0x13f   : > { %1613 = vst.msk [vmem:[%s2399_s11 + $0x1c] sm:$0xf] %vm1605_vm1, %v1819_v42  ;;  %v1438_v8 = vmax.f32 %v2372_v60, %v1963_v3  ;;  %v1193_v9 = vpop.f32.mrf.mxu0  ;;  %v1505_v36 = vmax.f32 %v1483_v35, 0.0  ;;  %v1369_v46 = vpop.f32.mrf.mxu1 }
 0x140   : > { %v1414_v34 = vmax.f32 %v2348_v49, %v1193_v9  ;;  %1618 = vst.msk [vmem:[%s2399_s11 + $0x30] sm:$0xf] %vm1605_vm1, %v1824_v56  ;;  %v1508_v47 = vmax.f32 %v1486_v45, 0.0  ;;  %v1484_v59 = vadd.f32 %v2387_v6, %v1455_v4  ;;  %v1436_v25 = vmax.f32 %v2350_v50, %v1369_v46 }
 0x141   : > { %v1460_v10 = vmax.f32 %v1416_v33, %v1438_v8  ;;  %v1920_v11 = vpop.f32.mrf.mxu0  ;;  %v1822_v12 = vpack.c.bf16 %v1505_v36, %v1505_v36  ;;  %v1964_v60 = vpop.f32.mrf.mxu1 }
 0x142   : > { %v1417_v26 = vmax.f32 %v2378_v63, %v1920_v11  ;;  %v1825_v48 = vpack.c.bf16 %v1508_v47, %v1508_v47  ;;  %v1506_v13 = vmax.f32 %v1484_v59, 0.0  ;;  %v1458_v37 = vmax.f32 %v1414_v34, %v1436_v25 }
 0x143   : > { %v1489_v49 = vadd.f32 %v2387_v6, %v1460_v10  ;;  %v1196_v39 = vpop.f32.mrf.mxu0  ;;  %1616 = vst.msk [vmem:[%s2399_s11 + $0x28] sm:$0xf] %vm1605_vm1, %v1822_v12  ;;  %v1439_v16 = vmax.f32 %v2380_v0, %v1964_v60  ;;  %v1372_v18 = vpop.f32.mrf.mxu1 }
 0x144   : > { %v1415_v17 = vmax.f32 %v2356_v53, %v1196_v39  ;;  %1619 = vst.msk [vmem:[%s2399_s11 + $0x34] sm:$0xf] %vm1605_vm1, %v1825_v48  ;;  %v1823_v50 = vpack.c.bf16 %v1506_v13, %v1506_v13  ;;  %v1487_v63 = vadd.f32 %v2387_v6, %v1458_v37  ;;  %v1437_v38 = vmax.f32 %v2358_v54, %v1372_v18 }
 0x145   : > { %v1511_v19 = vmax.f32 %v1489_v49, 0.0  ;;  %v1923_v20 = vpop.f32.mrf.mxu0  ;;  %v1461_v40 = vmax.f32 %v1417_v26, %v1439_v16  ;;  %v1967_v29 = vpop.f32.mrf.mxu1 }
 0x146   : > { %v1420_v51 = vmax.f32 %v2382_v5, %v1923_v20  ;;  %1617 = vst.msk [vmem:[%s2399_s11 + $0x2c] sm:$0xf] %vm1605_vm1, %v1823_v50  ;;  %v1509_v21 = vmax.f32 %v1487_v63, 0.0  ;;  %v1459_v53 = vmax.f32 %v1415_v17, %v1437_v38  ;;  %v1442_v22 = vmax.f32 %v2389_v7, %v1967_v29 }
 0x147   : > { %v1828_v0 = vpack.c.bf16 %v1511_v19, %v1511_v19  ;;  %v1209_v23 = vpop.f32.mrf.mxu0  ;;  %v1490_v24 = vadd.f32 %v2387_v6, %v1461_v40  ;;  %v1385_v27 = vpop.f32.mrf.mxu1 }
 0x148   : > { %v1418_v52 = vmax.f32 %v2364_v57, %v1209_v23  ;;  %v1826_v54 = vpack.c.bf16 %v1509_v21, %v1509_v21  ;;  %v1488_v5 = vadd.f32 %v2387_v6, %v1459_v53  ;;  %v1464_v41 = vmax.f32 %v1420_v51, %v1442_v22 }
 0x149   : > { %1622 = vst.msk [vmem:[%s2399_s11 + $0x40] sm:$0xf] %vm1605_vm1, %v1828_v0  ;;  %v1440_v30 = vmax.f32 %v2366_v58, %v1385_v27  ;;  %v1924_v43 = vpop.f32.mrf.mxu0  ;;  %v1512_v28 = vmax.f32 %v1490_v24, 0.0  ;;  %v1968_v7 = vpop.f32.mrf.mxu1 }
 0x14a   : > { %v1421_v31 = vmax.f32 %v2392_v14, %v1924_v43  ;;  %1620 = vst.msk [vmem:[%s2399_s11 + $0x38] sm:$0xf] %vm1605_vm1, %v1826_v54  ;;  %v1510_v32 = vmax.f32 %v1488_v5, 0.0  ;;  %v1493_v57 = vadd.f32 %v2387_v6, %v1464_v41  ;;  %v1443_v1 = vmax.f32 %v2394_v15, %v1968_v7 }
 0x14b   : > { %v1462_v42 = vmax.f32 %v1418_v52, %v1440_v30  ;;  %v1212_v55 = vpop.f32.mrf.mxu0  ;;  %v1829_v2 = vpack.c.bf16 %v1512_v28, %v1512_v28  ;;  %v1388_v44 = vpop.f32.mrf.mxu1 }
 0x14c   : > { %v1419_v58 = vmax.f32 %v2374_v61, %v1212_v55  ;;  %v1827_v35 = vpack.c.bf16 %v1510_v32, %v1510_v32  ;;  %v1515_v33 = vmax.f32 %v1493_v57, 0.0  ;;  %v1465_v3 = vmax.f32 %v1421_v31, %v1443_v1 }
 0x14d   : > { %v1491_v14 = vadd.f32 %v2387_v6, %v1462_v42  ;;  %1623 = vst.msk [vmem:[%s2399_s11 + $0x44] sm:$0xf] %vm1605_vm1, %v1829_v2  ;;  %v1441_v56 = vmax.f32 %v2376_v62, %v1388_v44 }
 0x14e   : > { %1621 = vst.msk [vmem:[%s2399_s11 + $0x3c] sm:$0xf] %vm1605_vm1, %v1827_v35  ;;  %v1832_v15 = vpack.c.bf16 %v1515_v33, %v1515_v33  ;;  %v1494_v4 = vadd.f32 %v2387_v6, %v1465_v3 }
 0x14f   : > { %v1513_v45 = vmax.f32 %v1491_v14, 0.0  ;;  %v1463_v61 = vmax.f32 %v1419_v58, %v1441_v56 }
 0x150   : > { %1626 = vst.msk [vmem:[%s2399_s11 + $0x50] sm:$0xf] %vm1605_vm1, %v1832_v15  ;;  %v1516_v9 = vmax.f32 %v1494_v4, 0.0 }
 0x151   : > { %v1830_v8 = vpack.c.bf16 %v1513_v45, %v1513_v45  ;;  %v1492_v36 = vadd.f32 %v2387_v6, %v1463_v61 }
 0x152   : > { %v1833_v34 = vpack.c.bf16 %v1516_v9, %v1516_v9 }
 0x153   : > { %1624 = vst.msk [vmem:[%s2399_s11 + $0x48] sm:$0xf] %vm1605_vm1, %v1830_v8  ;;  %v1514_v46 = vmax.f32 %v1492_v36, 0.0 }
 0x154   : > { %1627 = vst.msk [vmem:[%s2399_s11 + $0x54] sm:$0xf] %vm1605_vm1, %v1833_v34 }
 0x155   : > { %v1831_v62 = vpack.c.bf16 %v1514_v46, %v1514_v46 }
 0x157   : > { %1625 = vst.msk [vmem:[%s2399_s11 + $0x4c] sm:$0xf] %vm1605_vm1, %v1831_v62 }
 0x158 PF: > { %p10_p9 = scmp.ge.s32.totalorder %s2103_s16, 4   ;;  %s2520_s12 = smov %s2060_s13 }
 0x159   : > { %s2521_s13 = smov %s2112_s19  ;;  %s2522_s14 = smov %s2103_s16 }
 0x15a   :  { %12 = sbr.rel (!%p10_p9) target bundleno = 2 (0x2), region = 108 }

// kernel: cnn_forward.4
= control target key start
LH: loop header
LB: loop body
LE: loop exit
PB: predicated region body
PF: predicated region fallthrough
CT: control target
= control target key end

     0   :  { %s1240_s12 = smov 0   ;;  %s1242_s13 = smov 0   ;;  %s1460_s0 = inlined_call_operand.vmem [shape: bf16[4,64,288], index: 0, kind: input, shape index: {}]   ;;  %s1461_s1 = inlined_call_operand.vmem [shape: bf16[288,128], index: 1, kind: input, shape index: {}]   ;;  %s1462_s2 = inlined_call_operand.vmem [shape: f32[1,128], index: 2, kind: input, shape index: {}]   ;;  %s1463_s3 = inlined_call_operand.vmem [shape: bf16[64,128], index: 3, kind: output, shape index: {}]  }
   0x1   :  { %s1244_s14 = smov 0  }
   0x2 LB: > { %s895_s15 = sadd.s32 4294967295, %s1218_s14   ;;  %s1257_s16 = sadd.s32 1, %s1218_s14   ;;  %s1218_s14 = sphi %s1244_s14, %s1466_s14   ;;  %s1214_s13 = sphi %s1242_s13, %s1465_s13   ;;  %s1210_s12 = sphi %s1240_s12, %s1464_s12  }
   0x3   : > { %s17_s17 = ssub.s32 %s1218_s14, %s1257_s16  ;;  %s20_s18 = sadd.s32 1, %s1214_s13 }
   0x4   : > { %p18_p0 = scmp.eq.s32.totalorder %s17_s17, 0  ;;  %p27_p1 = scmp.ne.s32.totalorder %s1214_s13, %s1210_s12 }
   0x5   : > { %p28_p2 = scmp.eq.s32.totalorder %s1218_s14, 0  ;;  %p898_p4 = scmp.ge.s32.totalorder %s1218_s14, 2 }
   0x6   : > { %s1266_s19 = scalar_select %p18_p0, %s1214_s13, %s20_s18  }
   0x7   : > { %p29_p3 = por %p28_p2, %p27_p1  ;;  %127 = sbr.rel (%p898_p4) target bundleno = 35 (0x23), region = 24 }
   0xc   : > { %130 = sbr.rel (!%p29_p3) target bundleno = 35 (0x23), region = 28  ;;  %s132_s20 = sand.u32 (%p29_p3), 1, %s1214_s13  }
   0xd   : > { %s1120_s21 = smul.u32 (%p29_p3), 48, %s1218_s14 }
   0xe   : > { %s1119_s22 = smul.u32 (%p29_p3), 192, %s132_s20 }
   0xf   : > { %s1274_s25 = scalar_lea.vmem (%p29_p3), %s1460_s0, %s1120_s21 }
  0x10   : > { %v153_v0 = vld [vmem:[%s1274_s25] sm:$0xff] (%p29_p3)  ;;  %v155_v1 = vld [vmem:[%s1274_s25 + $0xc] sm:$0xff] (%p29_p3)  ;;  %v157_v2 = vld [vmem:[%s1274_s25 + $0x18] sm:$0xff] (%p29_p3)  ;;  %s1279_s26 = scalar_lea.vmem (%p29_p3), [#allocation2], %s1119_s22 }
  0x11   : > { %154 = vst [vmem:[%s1279_s26] sm:$0xff] %v153_v0  ;;  %156 = vst [vmem:[%s1279_s26 + $0xc] sm:$0xff] %v155_v1  ;;  %v159_v3 = vld [vmem:[%s1274_s25 + $0x24] sm:$0xff]  ;;  %v163_v5 = vld [vmem:[%s1274_s25 + $0x6c] sm:$0xff] }
  0x12   : > { %158 = vst [vmem:[%s1279_s26 + $0x18] sm:$0xff] %v157_v2  ;;  %v161_v4 = vld [vmem:[%s1274_s25 + $0x60] sm:$0xff]  ;;  %160 = vst [vmem:[%s1279_s26 + $0x24] sm:$0xff] %v159_v3  ;;  %v165_v6 = vld [vmem:[%s1274_s25 + $0x78] sm:$0xff] }
  0x13   : > { %162 = vst [vmem:[%s1279_s26 + $0x30] sm:$0xff] %v161_v4  ;;  %164 = vst [vmem:[%s1279_s26 + $0x3c] sm:$0xff] %v163_v5  ;;  %v167_v7 = vld [vmem:[%s1274_s25 + $0x84] sm:$0xff]  ;;  %v171_v9 = vld [vmem:[%s1274_s25 + $0xcc] sm:$0xff] }
  0x14   : > { %v169_v8 = vld [vmem:[%s1274_s25 + $0xc0] sm:$0xff]  ;;  %166 = vst [vmem:[%s1279_s26 + $0x48] sm:$0xff] %v165_v6  ;;  %168 = vst [vmem:[%s1279_s26 + $0x54] sm:$0xff] %v167_v7  ;;  %v173_v10 = vld [vmem:[%s1274_s25 + $0xd8] sm:$0xff] }
  0x15   : > { %170 = vst [vmem:[%s1279_s26 + $0x60] sm:$0xff] %v169_v8  ;;  %v175_v11 = vld [vmem:[%s1274_s25 + $0xe4] sm:$0xff]  ;;  %172 = vst [vmem:[%s1279_s26 + $0x6c] sm:$0xff] %v171_v9  ;;  %v179_v13 = vld [vmem:[%s1274_s25 + $0x12c] sm:$0xff] }
  0x16   : > { %174 = vst [vmem:[%s1279_s26 + $0x78] sm:$0xff] %v173_v10  ;;  %176 = vst [vmem:[%s1279_s26 + $0x84] sm:$0xff] %v175_v11  ;;  %v177_v12 = vld [vmem:[%s1274_s25 + $0x120] sm:$0xff]  ;;  %v181_v14 = vld [vmem:[%s1274_s25 + $0x138] sm:$0xff] }
  0x17   : > { %178 = vst [vmem:[%s1279_s26 + $0x90] sm:$0xff] %v177_v12  ;;  %180 = vst [vmem:[%s1279_s26 + $0x9c] sm:$0xff] %v179_v13  ;;  %v183_v15 = vld [vmem:[%s1274_s25 + $0x144] sm:$0xff]  ;;  %v904_v17 = vld [vmem:[%s1274_s25 + $0x14] sm:$0xf] }
  0x18   : > { %182 = vst [vmem:[%s1279_s26 + $0xa8] sm:$0xff] %v181_v14  ;;  %v902_v16 = vld [vmem:[%s1274_s25 + $0x8] sm:$0xf]  ;;  %184 = vst [vmem:[%s1279_s26 + $0xb4] sm:$0xff] %v183_v15  ;;  %v906_v18 = vld [vmem:[%s1274_s25 + $0x20] sm:$0xf] }
  0x19   : > { %903 = vst [vmem:[%s1279_s26 + $0x8] sm:$0xf] %v902_v16  ;;  %905 = vst [vmem:[%s1279_s26 + $0x14] sm:$0xf] %v904_v17  ;;  %v908_v19 = vld [vmem:[%s1274_s25 + $0x2c] sm:$0xf] }
  0x1a   : > { %v910_v20 = vld [vmem:[%s1274_s25 + $0x68] sm:$0xf]  ;;  %907 = vst [vmem:[%s1279_s26 + $0x20] sm:$0xf] %v906_v18  ;;  %909 = vst [vmem:[%s1279_s26 + $0x2c] sm:$0xf] %v908_v19 }
  0x1b   : > { %911 = vst [vmem:[%s1279_s26 + $0x38] sm:$0xf] %v910_v20  ;;  %v912_v21 = vld [vmem:[%s1274_s25 + $0x74] sm:$0xf]  ;;  %v914_v22 = vld [vmem:[%s1274_s25 + $0x80] sm:$0xf] }
  0x1c   : > { %v916_v23 = vld [vmem:[%s1274_s25 + $0x8c] sm:$0xf]  ;;  %913 = vst [vmem:[%s1279_s26 + $0x44] sm:$0xf] %v912_v21  ;;  %915 = vst [vmem:[%s1279_s26 + $0x50] sm:$0xf] %v914_v22 }
  0x1d   : > { %917 = vst [vmem:[%s1279_s26 + $0x5c] sm:$0xf] %v916_v23  ;;  %v918_v24 = vld [vmem:[%s1274_s25 + $0xc8] sm:$0xf]  ;;  %v920_v25 = vld [vmem:[%s1274_s25 + $0xd4] sm:$0xf] }
  0x1e   : > { %v922_v26 = vld [vmem:[%s1274_s25 + $0xe0] sm:$0xf]  ;;  %919 = vst [vmem:[%s1279_s26 + $0x68] sm:$0xf] %v918_v24  ;;  %921 = vst [vmem:[%s1279_s26 + $0x74] sm:$0xf] %v920_v25 }
  0x1f   : > { %923 = vst [vmem:[%s1279_s26 + $0x80] sm:$0xf] %v922_v26  ;;  %v924_v27 = vld [vmem:[%s1274_s25 + $0xec] sm:$0xf]  ;;  %v926_v28 = vld [vmem:[%s1274_s25 + $0x128] sm:$0xf] }
  0x20   : > { %v928_v29 = vld [vmem:[%s1274_s25 + $0x134] sm:$0xf]  ;;  %925 = vst [vmem:[%s1279_s26 + $0x8c] sm:$0xf] %v924_v27  ;;  %927 = vst [vmem:[%s1279_s26 + $0x98] sm:$0xf] %v926_v28 }
  0x21   : > { %929 = vst [vmem:[%s1279_s26 + $0xa4] sm:$0xf] %v928_v29  ;;  %v930_v30 = vld [vmem:[%s1274_s25 + $0x140] sm:$0xf]  ;;  %v932_v31 = vld [vmem:[%s1274_s25 + $0x14c] sm:$0xf] }
  0x22   : > { %931 = vst [vmem:[%s1279_s26 + $0xb0] sm:$0xf] %v930_v30  ;;  %933 = vst [vmem:[%s1279_s26 + $0xbc] sm:$0xf] %v932_v31 }
  0x23 PF: > { %p934_p5 = scmp.ge.s32.totalorder %s1218_s14, 1  ;;  %p229_p6 = scmp.lt.s32.totalorder %s1218_s14, 3 }
  0x25   : > { %p230_p7 = pnand %p934_p5, %p229_p6 }
  0x26   : > { %s236_s17 = sand.u32 (!%p230_p7), 1, %s1210_s12   ;;  %s1437_s23 = sshll.u32 (!%p230_p7), %s895_s15, 2 }
  0x27   : > { %233 = sbr.rel (%p230_p7) target bundleno = 331 (0x14b), region = 54  ;;  %p261_p8 = scmp.lt.s32.totalorder (!%p230_p7), %s1437_s23, 7 }
  0x28   : > { %s1121_s21 = smul.u32 (!%p230_p7), 192, %s236_s17 }
  0x2a   : > { %s1378_s29 = scalar_lea.vmem (!%p230_p7), [#allocation2], %s1121_s21 }
  0x2c   : > { %v1146_v32 = vld [vmem:[%s1461_s1 + $0x78] sm:$0xff]   ;;  %v1148_v34 = vld [vmem:[%s1461_s1 + $0x70] sm:$0xff]   ;;  %v1150_v36 = vld [vmem:[%s1461_s1 + $0x68] sm:$0xff]   ;;  %vm563_vm0 = vcmask 261120   ;;  %s1468_s23 = smov (!%p261_p8, %s1437_s23), 7 }
  0x2d   : > { %v1147_v33 = vld [vmem:[%s1461_s1 + $0x38] sm:$0xff]   ;;  %1009 = vmatprep.subr.bf16.mxu0 %v1146_v32  ;;  %1103 = vmatprep.subr.bf16.mxu1 %v1146_v32  ;;  %v1149_v35 = vld [vmem:[%s1461_s1 + $0x30] sm:$0xff]   ;;  %v1151_v37 = vld [vmem:[%s1461_s1 + $0x28] sm:$0xff]   ;;  %s936_s24 = sshll.u32 %s1468_s23, 2 }
  0x2e   : > { %1010 = vmatpush3.bf16.msra.mxu0 %v1147_v33  ;;  %1111 = vmatpush3.bf16.msra.mxu1 %v1147_v33  ;;  %v1152_v38 = vld [vmem:[%s1461_s1 + $0x60] sm:$0xff]   ;;  %v1154_v40 = vld [vmem:[%s1461_s1 + $0x58] sm:$0xff]   ;;  %v1156_v42 = vld [vmem:[%s1461_s1 + $0x50] sm:$0xff]   ;;  %s264_s26 = scalar_lea.vmem %s1463_s3, %s936_s24 }
  0x2f   : > { %1011 = vmatprep.subr.bf16.mxu0 %v1148_v34  ;;  %1104 = vmatprep.subr.bf16.mxu1 %v1148_v34  ;;  %v1153_v39 = vld [vmem:[%s1461_s1 + $0x20] sm:$0xff]   ;;  %v1155_v41 = vld [vmem:[%s1461_s1 + $0x18] sm:$0xff]   ;;  %v1157_v45 = vld [vmem:[%s1461_s1 + $0x10] sm:$0xff]  }
  0x30   : > { %v1164_v43 = vld [vmem:[%s1378_s29 + $0x4] ss:$12 sps:$4 sm:$0xff]   ;;  %v1167_v44 = vld [vmem:[%s1378_s29 + $0x94] ss:$12 sps:$4 sm:$0xff]   ;;  %v1158_v46 = vld [vmem:[%s1461_s1 + $0x48] sm:$0xff]  }
  0x31   : > { %620 = vmatprep.mubr.bf16.mxu0 %v1164_v43  ;;  %668 = vmatprep.mubr.bf16.mxu1 %v1167_v44  ;;  %v1159_v47 = vld [vmem:[%s1461_s1 + $0x8] sm:$0xff]   ;;  %v1160_v48 = vld [vmem:[%s1461_s1 + $0x40] sm:$0xff]   ;;  %v1165_v52 = vld [vmem:[%s1378_s29 + $0x90] ss:$12 sps:$4 sm:$0xff]  }
  0x32   : > { %1012 = vmatpush3.bf16.msra.mxu0 %v1149_v35  ;;  %1112 = vmatpush3.bf16.msra.mxu1 %v1149_v35  ;;  %v1161_v49 = vld [vmem:[%s1461_s1] sm:$0xff]   ;;  %v1168_v51 = vld [vmem:[%s1461_s1 + $0x88] sm:$0xff]   ;;  %v1179_v60 = vld [vmem:[%s1378_s29 + $0x30] ss:$12 sps:$4 sm:$0xff]  }
  0x33   : > { %1013 = vmatprep.subr.bf16.mxu0 %v1150_v36  ;;  %1105 = vmatprep.subr.bf16.mxu1 %v1150_v36  ;;  %v1162_v50 = vld [vmem:[%s1378_s29] ss:$12 sps:$4 sm:$0xff]   ;;  %v1169_v53 = vld [vmem:[%s1378_s29 + $0x1c] ss:$12 sps:$4 sm:$0xff]   ;;  %v1173_v56 = vld [vmem:[%s1378_s29 + $0x18] ss:$12 sps:$4 sm:$0xff]  }
  0x34   : > { %v1171_v54 = vld [vmem:[%s1378_s29 + $0xac] ss:$12 sps:$4 sm:$0xff]   ;;  %v1175_v55 = vld [vmem:[%s1461_s1 + $0x80] sm:$0xff]   ;;  %v1174_v57 = vld [vmem:[%s1378_s29 + $0xa8] ss:$12 sps:$4 sm:$0xff]  }
  0x35   : > { %v1176_v58 = vld [vmem:[%s1378_s29 + $0x34] ss:$12 sps:$4 sm:$0xff]   ;;  %v1181_v62 = vld [vmem:[%s1378_s29 + $0x4c] ss:$12 sps:$4 sm:$0xff]   ;;  %v1185_v1 = vld [vmem:[%s1378_s29 + $0x50] ss:$12 sps:$4 sm:$0xff]  }
  0x36   : > { %1014 = vmatpush3.bf16.msra.mxu0 %v1151_v37  ;;  %1113 = vmatpush3.bf16.msra.mxu1 %v1151_v37  ;;  %v1178_v59 = vld [vmem:[%s1378_s29 + $0x8] ss:$12 sps:$4 sm:$0xff]   ;;  %v1180_v61 = vld [vmem:[%s1378_s29 + $0x20] ss:$12 sps:$4 sm:$0xff]   ;;  %v1183_v63 = vld [vmem:[%s1378_s29 + $0x38] ss:$12 sps:$4 sm:$0xff]  }
  0x37   : > { %1015 = vmatprep.subr.bf16.mxu0 %v1152_v38  ;;  %1106 = vmatprep.subr.bf16.mxu1 %v1152_v38  ;;  %v1184_v0 = vld [vmem:[%s1378_s29 + $0x48] ss:$12 sps:$4 sm:$0xff]   ;;  %v1186_v2 = vld [vmem:[%s1378_s29 + $0x64] ss:$12 sps:$4 sm:$0xff]   ;;  %v1189_v4 = vld [vmem:[%s1378_s29 + $0x60] ss:$12 sps:$4 sm:$0xff]  }
  0x38   : > { %v1188_v3 = vld [vmem:[%s1378_s29 + $0x68] ss:$12 sps:$4 sm:$0xff]   ;;  %v1190_v5 = vld [vmem:[%s1378_s29 + $0x80] ss:$12 sps:$4 sm:$0xff]   ;;  %v1193_v7 = vld [vmem:[%s1378_s29 + $0x98] ss:$12 sps:$4 sm:$0xff]  }
  0x39   : > { %v1191_v6 = vld [vmem:[%s1378_s29 + $0x7c] ss:$12 sps:$4 sm:$0xff]   ;;  %v1194_v8 = vld [vmem:[%s1378_s29 + $0x78] ss:$12 sps:$4 sm:$0xff]  }
  0x3a   : > { %1016 = vmatpush3.bf16.msra.mxu0 %v1153_v39  ;;  %1114 = vmatpush3.bf16.msra.mxu1 %v1153_v39  ;;  %v1195_v9 = vld [vmem:[%s1378_s29 + $0xb0] ss:$12 sps:$4 sm:$0xff]  }
  0x3b   : > { %1017 = vmatprep.subr.bf16.mxu0 %v1154_v40  ;;  %1107 = vmatprep.subr.bf16.mxu1 %v1154_v40 }
  0x3e   : > { %1018 = vmatpush3.bf16.msra.mxu0 %v1155_v41  ;;  %1115 = vmatpush3.bf16.msra.mxu1 %v1155_v41 }
  0x3f   : > { %1019 = vmatprep.subr.bf16.mxu0 %v1156_v42  ;;  %1108 = vmatprep.subr.bf16.mxu1 %v1156_v42 }
  0x42   : > { %1020 = vmatpush3.bf16.msra.mxu0 %v1157_v45  ;;  %1116 = vmatpush3.bf16.msra.mxu1 %v1157_v45 }
  0x43   : > { %1021 = vmatprep.subr.bf16.mxu0 %v1158_v46  ;;  %1109 = vmatprep.subr.bf16.mxu1 %v1158_v46 }
  0x46   : > { %1022 = vmatpush3.bf16.msra.mxu0 %v1159_v47  ;;  %1117 = vmatpush3.bf16.msra.mxu1 %v1159_v47 }
  0x47   : > { %1023 = vmatprep.subr.bf16.mxu0 %v1160_v48  ;;  %1110 = vmatprep.subr.bf16.mxu1 %v1160_v48 }
  0x4a   : > { %1024 = vmatpush3.bf16.msra.mxu0 %v1161_v49  ;;  %1118 = vmatpush3.bf16.msra.mxu1 %v1161_v49 }
  0x4b   : > { %1083 = vmatprep.subr.bf16.mxu1 %v1168_v51 }
  0x4d   : > { %621 = vmatmul.mubr.bf16.vlgmr.msra.gmra.mxu0 %v1162_v50  ;;  %669 = vmatmul.mubr.bf16.vlgmr.msra.gmra.mxu1 %v1165_v52 }
  0x4e   : > { %1084 = vmatpush3.bf16.msra.mxu1 %v1168_v51  ;;  %628 = vmatprep.mubr.bf16.mxu0 %v1169_v53 }
  0x4f   : > { %676 = vmatprep.mubr.bf16.mxu1 %v1171_v54  ;;  %1085 = vmatprep.subr.bf16.mxu1 %v1175_v55 }
  0x52   : > { %1086 = vmatpush3.bf16.msra.mxu1 %v1175_v55 }
  0x55   : > { %629 = vmatmul.mubr.bf16.gmra.mxu0 %v1173_v56  ;;  %677 = vmatmul.mubr.bf16.gmra.mxu1 %v1174_v57 }
  0x56   : > { %636 = vmatprep.mubr.bf16.mxu0 %v1176_v58  ;;  %1087 = vmatprep.mubr.msk.bf16.mxu1 %vm563_vm0, %v1178_v59 }
  0x5d   : > { %637 = vmatmul.mubr.bf16.gmra.mxu0 %v1179_v60  ;;  %1088 = vmatmul.mubr.msk.bf16.vlgmr.msra.gmra.mxu1 %vm563_vm0, %v1180_v61 }
  0x5e   : > { %644 = vmatprep.mubr.bf16.mxu0 %v1181_v62  ;;  %1091 = vmatprep.mubr.msk.bf16.mxu1 %vm563_vm0, %v1183_v63 }
  0x65   : > { %645 = vmatmul.mubr.bf16.gmra.mxu0 %v1184_v0  ;;  %1092 = vmatmul.mubr.msk.bf16.gmra.mxu1 %vm563_vm0, %v1185_v1 }
  0x66   : > { %652 = vmatprep.mubr.bf16.mxu0 %v1186_v2  ;;  %1095 = vmatprep.mubr.msk.bf16.mxu1 %vm563_vm0, %v1188_v3 }
  0x6d   : > { %653 = vmatmul.mubr.bf16.gmra.mxu0 %v1189_v4  ;;  %1096 = vmatmul.mubr.msk.bf16.gmra.mxu1 %vm563_vm0, %v1190_v5 }
  0x6e   : > { %660 = vmatprep.mubr.bf16.mxu0 %v1191_v6  ;;  %1099 = vmatprep.mubr.msk.bf16.mxu1 %vm563_vm0, %v1193_v7 }
  0x75   : > { %661 = vmatmul.mubr.bf16.gmra.mxu0 %v1194_v8  ;;  %1100 = vmatmul.mubr.msk.bf16.gmra.mxu1 %vm563_vm0, %v1195_v9 }
 0x10d   : > { %v1025_v10 = vpop.f32.mrf.mxu0  ;;  %v1061_v11 = vpop.f32.mrf.mxu1 }
 0x10f   : > { %v1026_v12 = vpop.f32.mrf.mxu0  ;;  %v1062_v13 = vpop.f32.mrf.mxu1 }
 0x110   : > { %v1027_v53 = vadd.f32 %v1026_v12, %v1025_v10  ;;  %v1063_v54 = vadd.f32 %v1062_v13, %v1061_v11 }
 0x111   : > { %v1028_v14 = vpop.f32.mrf.mxu0  ;;  %v1064_v15 = vpop.f32.mrf.mxu1 }
 0x113   : > { %v1029_v16 = vpop.f32.mrf.mxu0  ;;  %v1065_v17 = vpop.f32.mrf.mxu1 }
 0x114   : > { %v1030_v55 = vadd.f32 %v1029_v16, %v1028_v14  ;;  %v1066_v58 = vadd.f32 %v1065_v17, %v1064_v15 }
 0x115   : > { %v1031_v18 = vpop.f32.mrf.mxu0  ;;  %v1067_v19 = vpop.f32.mrf.mxu1 }
 0x117   : > { %v1032_v20 = vpop.f32.mrf.mxu0  ;;  %v1068_v21 = vpop.f32.mrf.mxu1 }
 0x118   : > { %v1033_v59 = vadd.f32 %v1032_v20, %v1031_v18  ;;  %v1069_v60 = vadd.f32 %v1068_v21, %v1067_v19 }
 0x119   : > { %v1034_v22 = vpop.f32.mrf.mxu0  ;;  %v1070_v23 = vpop.f32.mrf.mxu1 }
 0x11b   : > { %v1035_v24 = vpop.f32.mrf.mxu0  ;;  %v1071_v25 = vpop.f32.mrf.mxu1 }
 0x11c   : > { %v1036_v8 = vadd.f32 %v1035_v24, %v1034_v22  ;;  %v1072_v9 = vadd.f32 %v1071_v25, %v1070_v23 }
 0x11d   : > { %v1037_v26 = vpop.f32.mrf.mxu0  ;;  %v1089_v27 = vpop.f32.mrf.mxu1 }
 0x11e   : > { %v728_v10 = vadd.f32 %v1089_v27, %v1033_v59 }
 0x11f   : > { %v1038_v28 = vpop.f32.mrf.mxu0  ;;  %v719_v29 = vpop.f32.mrf.mxu1 }
 0x120   : > { %v1039_v51 = vadd.f32 %v1038_v28, %v1037_v26  ;;  %v720_v4 = vadd.f32 %v1027_v53, %v719_v29 }
 0x121   : > { %v1040_v30 = vpop.f32.mrf.mxu0  ;;  %v1433_v31 = vpop.f32.mrf.mxu1 }
 0x122   : > { %v731_v25 = vadd.f32 %v1433_v31, %v1036_v8 }
 0x123   : > { %v1041_v32 = vpop.f32.mrf.mxu0  ;;  %v722_v33 = vpop.f32.mrf.mxu1 }
 0x124   : > { %v1042_v62 = vadd.f32 %v1041_v32, %v1040_v30  ;;  %v723_v18 = vadd.f32 %v1030_v55, %v722_v33  ;;  %v987_v30 = vld [vmem:[%s1462_s2] ss:$0 sm:$0xff] }
 0x125   : > { %v1043_v34 = vpop.f32.mrf.mxu0  ;;  %v1093_v35 = vpop.f32.mrf.mxu1 }
 0x127   : > { %v1044_v36 = vpop.f32.mrf.mxu0  ;;  %v735_v37 = vpop.f32.mrf.mxu1 }
 0x128   : > { %v1045_v48 = vadd.f32 %v1044_v36, %v1043_v34  ;;  %v736_v61 = vadd.f32 %v1039_v51, %v735_v37 }
 0x129   : > { %v1046_v38 = vpop.f32.mrf.mxu0  ;;  %v1094_v39 = vpop.f32.mrf.mxu1 }
 0x12a   : > { %v744_v63 = vadd.f32 %v1093_v35, %v1045_v48  ;;  %v782_v14 = vmax.f32 %v720_v4, %v736_v61 }
 0x12b   : > { %v1047_v40 = vpop.f32.mrf.mxu0  ;;  %v738_v41 = vpop.f32.mrf.mxu1 }
 0x12c   : > { %v1048_v0 = vadd.f32 %v1047_v40, %v1046_v38  ;;  %v739_v11 = vadd.f32 %v1042_v62, %v738_v41  ;;  %v784_v19 = vmax.f32 %v728_v10, %v744_v63 }
 0x12d   : > { %v1049_v42 = vpop.f32.mrf.mxu0  ;;  %v1097_v43 = vpop.f32.mrf.mxu1 }
 0x12e   : > { %v747_v20 = vadd.f32 %v1094_v39, %v1048_v0  ;;  %v783_v27 = vmax.f32 %v723_v18, %v739_v11 }
 0x12f   : > { %v1050_v44 = vpop.f32.mrf.mxu0  ;;  %v751_v45 = vpop.f32.mrf.mxu1 }
 0x130   : > { %v1051_v52 = vadd.f32 %v1050_v44, %v1049_v42  ;;  %v785_v36 = vmax.f32 %v731_v25, %v747_v20 }
 0x131   : > { %v1052_v46 = vpop.f32.mrf.mxu0  ;;  %v1098_v47 = vpop.f32.mrf.mxu1 }
 0x132   : > { %v752_v5 = vadd.f32 %v1051_v52, %v751_v45 }
 0x133   : > { %v1053_v49 = vpop.f32.mrf.mxu0  ;;  %v754_v50 = vpop.f32.mrf.mxu1 }
 0x134   : > { %v1054_v1 = vadd.f32 %v1053_v49, %v1052_v46 }
 0x135   : > { %v1055_v56 = vpop.f32.mrf.mxu0  ;;  %v1101_v57 = vpop.f32.mrf.mxu1 }
 0x136   : > { %v776_v15 = vadd.f32 %v1101_v57, %v1069_v60  ;;  %v755_v21 = vadd.f32 %v1054_v1, %v754_v50 }
 0x137   : > { %v1056_v2 = vpop.f32.mrf.mxu0  ;;  %v767_v3 = vpop.f32.mrf.mxu1 }
 0x138   : > { %v1057_v6 = vadd.f32 %v1056_v2, %v1055_v56  ;;  %v768_v7 = vadd.f32 %v1063_v54, %v767_v3 }
 0x139   : > { %v1058_v12 = vpop.f32.mrf.mxu0  ;;  %v1102_v13 = vpop.f32.mrf.mxu1 }
 0x13a   : > { %v760_v16 = vadd.f32 %v1097_v43, %v1057_v6  ;;  %v786_v17 = vmax.f32 %v752_v5, %v768_v7  ;;  %v779_v33 = vadd.f32 %v1102_v13, %v1072_v9 }
 0x13b   : > { %v1059_v26 = vpop.f32.mrf.mxu0  ;;  %v770_v28 = vpop.f32.mrf.mxu1 }
 0x13c   : > { %v788_v29 = vmax.f32 %v760_v16, %v776_v15  ;;  %v790_v22 = vmax.f32 %v782_v14, %v786_v17  ;;  %v1060_v23 = vadd.f32 %v1059_v26, %v1058_v12  ;;  %v771_v24 = vadd.f32 %v1066_v58, %v770_v28 }
 0x13e   : > { %v792_v32 = vmax.f32 %v784_v19, %v788_v29  ;;  %v763_v34 = vadd.f32 %v1098_v47, %v1060_v23  ;;  %v787_v35 = vmax.f32 %v755_v21, %v771_v24  ;;  %v801_v37 = vadd.f32 %v987_v30, %v790_v22 }
 0x140   : > { %v789_v38 = vmax.f32 %v763_v34, %v779_v33  ;;  %v791_v39 = vmax.f32 %v783_v27, %v787_v35  ;;  %v803_v40 = vadd.f32 %v987_v30, %v792_v32  ;;  %v805_v31 = vmax.f32 %v801_v37, 0.0 }
 0x142   : > { %v793_v41 = vmax.f32 %v785_v36, %v789_v38  ;;  %v802_v42 = vadd.f32 %v987_v30, %v791_v39  ;;  %v807_v45 = vmax.f32 %v803_v40, 0.0 }
 0x144   : > { %v804_v43 = vadd.f32 %v987_v30, %v793_v41  ;;  %v806_v44 = vmax.f32 %v802_v42, 0.0 }
 0x146   : > { %v808_v46 = vmax.f32 %v804_v43, 0.0  ;;  %v1001_v47 = vpack.c.bf16 %v806_v44, %v805_v31 }
 0x148   : > { %v1006_v48 = vpack.c.bf16 %v808_v46, %v807_v45  ;;  %1002 = vst [vmem:[%s264_s26] sm:$0xff] %v1001_v47  }
 0x14a   : > { %1008 = vst [vmem:[%s264_s26 + $0x8] sm:$0xff] %v1006_v48  }
 0x14b PF: > { %p10_p9 = scmp.ge.s32.totalorder %s1257_s16, 4   ;;  %s1464_s12 = smov %s1214_s13 }
 0x14c   : > { %s1465_s13 = smov %s1266_s19  ;;  %s1466_s14 = smov %s1257_s16 }
 0x14d   :  { %12 = sbr.rel (!%p10_p9) target bundleno = 2 (0x2), region = 99 }

// kernel: cnn_forward.5
= control target key start
LH: loop header
LB: loop body
LE: loop exit
PB: predicated region body
PF: predicated region fallthrough
CT: control target
= control target key end

     0   :  { %vm3265_vm0 = vmmov 0   ;;  %s4007_s1 = inlined_call_operand.vmem [shape: bf16[3200,128], index: 1, kind: input, shape index: {}]   ;;  %s4008_s0 = inlined_call_operand.vmem [shape: bf16[16,3200], index: 0, kind: input, shape index: {}]   ;;  %s4009_s3 = inlined_call_operand.vmem [shape: bf16[128,128], index: 3, kind: input, shape index: {}]   ;;  %s4010_s2 = inlined_call_operand.vmem [shape: f32[1,128], index: 2, kind: input, shape index: {}]   ;;  %s4011_s4 = inlined_call_operand.vmem [shape: f32[1,128], index: 4, kind: input, shape index: {}]   ;;  %s4012_s5 = inlined_call_operand.vmem [shape: f32[16,128], index: 5, kind: output, shape index: {}]  }
   0x1   :  { %v3011_v0 = vld [vmem:[%s4007_s1 + $0x78] sm:$0xff]   ;;  %v3015_v4 = vld [vmem:[%s4007_s1 + $0x70] sm:$0xff]   ;;  %v3019_v8 = vld [vmem:[%s4007_s1 + $0x68] sm:$0xff]  }
   0x2   :  { %v3012_v1 = vld [vmem:[%s4007_s1 + $0x38] sm:$0xff]   ;;  %2687 = vmatprep.subr.bf16.mxu0 %v3011_v0  ;;  %v3016_v5 = vld [vmem:[%s4007_s1 + $0x30] sm:$0xff]   ;;  %v3020_v9 = vld [vmem:[%s4007_s1 + $0x28] sm:$0xff]  }
   0x3   :  { %v3013_v2 = vld [vmem:[%s4007_s1 + $0xf8] sm:$0xff]   ;;  %2688 = vmatpush3.bf16.msra.mxu0 %v3012_v1  ;;  %v3017_v6 = vld [vmem:[%s4007_s1 + $0xf0] sm:$0xff]   ;;  %v3021_v10 = vld [vmem:[%s4007_s1 + $0xe8] sm:$0xff]  }
   0x4   :  { %v3014_v3 = vld [vmem:[%s4007_s1 + $0xb8] sm:$0xff]   ;;  %2709 = vmatprep.subr.bf16.mxu1 %v3013_v2  ;;  %2689 = vmatprep.subr.bf16.mxu0 %v3015_v4  ;;  %v3018_v7 = vld [vmem:[%s4007_s1 + $0xb0] sm:$0xff]   ;;  %v3022_v11 = vld [vmem:[%s4007_s1 + $0xa8] sm:$0xff]  }
   0x5   :  { %2710 = vmatpush3.bf16.msra.mxu1 %v3014_v3  ;;  %v3023_v12 = vld [vmem:[%s4007_s1 + $0x60] sm:$0xff]   ;;  %v3027_v16 = vld [vmem:[%s4007_s1 + $0x58] sm:$0xff]   ;;  %v3031_v20 = vld [vmem:[%s4007_s1 + $0x50] sm:$0xff]  }
   0x6   :  { %2711 = vmatprep.subr.bf16.mxu1 %v3017_v6  ;;  %v3024_v13 = vld [vmem:[%s4007_s1 + $0x20] sm:$0xff]   ;;  %v3028_v17 = vld [vmem:[%s4007_s1 + $0x18] sm:$0xff]   ;;  %v3032_v21 = vld [vmem:[%s4007_s1 + $0x10] sm:$0xff]  }
   0x7   :  { %2690 = vmatpush3.bf16.msra.mxu0 %v3016_v5  ;;  %v3025_v14 = vld [vmem:[%s4007_s1 + $0xe0] sm:$0xff]   ;;  %v3029_v18 = vld [vmem:[%s4007_s1 + $0xd8] sm:$0xff]   ;;  %v3033_v22 = vld [vmem:[%s4007_s1 + $0xd0] sm:$0xff]  }
   0x8   :  { %2691 = vmatprep.subr.bf16.mxu0 %v3019_v8  ;;  %v3026_v15 = vld [vmem:[%s4007_s1 + $0xa0] sm:$0xff]   ;;  %v3030_v19 = vld [vmem:[%s4007_s1 + $0x98] sm:$0xff]   ;;  %v3034_v23 = vld [vmem:[%s4007_s1 + $0x90] sm:$0xff]  }
   0x9   :  { %2712 = vmatpush3.bf16.msra.mxu1 %v3018_v7  ;;  %v3035_v24 = vld [vmem:[%s4007_s1 + $0x48] sm:$0xff]   ;;  %v3039_v28 = vld [vmem:[%s4007_s1 + $0x40] sm:$0xff]   ;;  %v3046_v34 = vld [vmem:[%s4007_s1 + $0x178] sm:$0xff]  }
   0xa   :  { %2713 = vmatprep.subr.bf16.mxu1 %v3021_v10  ;;  %v3036_v25 = vld [vmem:[%s4007_s1 + $0x8] sm:$0xff]   ;;  %v3040_v29 = vld [vmem:[%s4007_s1] sm:$0xff]   ;;  %v3050_v37 = vld [vmem:[%s4007_s1 + $0x138] sm:$0xff]  }
   0xb   :  { %2692 = vmatpush3.bf16.msra.mxu0 %v3020_v9  ;;  %v3037_v26 = vld [vmem:[%s4007_s1 + $0xc8] sm:$0xff]   ;;  %v3041_v30 = vld [vmem:[%s4007_s1 + $0xc0] sm:$0xff]   ;;  %v3051_v38 = vld [vmem:[%s4007_s1 + $0x1f8] sm:$0xff]  }
   0xc   :  { %2693 = vmatprep.subr.bf16.mxu0 %v3023_v12  ;;  %v3038_v27 = vld [vmem:[%s4007_s1 + $0x88] sm:$0xff]   ;;  %v3042_v31 = vld [vmem:[%s4008_s0] ss:$100 sps:$4 sm:$0xff]   ;;  %v3052_v39 = vld [vmem:[%s4007_s1 + $0x1b8] sm:$0xff]  }
   0xd   :  { %2714 = vmatpush3.bf16.msra.mxu1 %v3022_v11  ;;  %v3044_v32 = vld [vmem:[%s4008_s0 + $0x4] ss:$100 sps:$4 sm:$0xff]   ;;  %v3049_v36 = vld [vmem:[%s4008_s0 + $0xc] ss:$100 sps:$4 sm:$0xff]   ;;  %v3065_v52 = vld [vmem:[%s4007_s1 + $0x158] sm:$0xff]  }
   0xe   :  { %2715 = vmatprep.subr.bf16.mxu1 %v3025_v14  ;;  %v3045_v33 = vld [vmem:[%s4007_s1 + $0x80] sm:$0xff]   ;;  %1812 = vmatprep.mubr.bf16.mxu0 %v3044_v32  ;;  %v3047_v35 = vld [vmem:[%s4008_s0 + $0x8] ss:$100 sps:$4 sm:$0xff]   ;;  %v3053_v40 = vld [vmem:[%s4007_s1 + $0x170] sm:$0xff]  }
   0xf   :  { %2694 = vmatpush3.bf16.msra.mxu0 %v3024_v13  ;;  %1853 = vmatprep.mubr.bf16.mxu1 %v3049_v36  ;;  %v3054_v41 = vld [vmem:[%s4007_s1 + $0x130] sm:$0xff]   ;;  %v3057_v44 = vld [vmem:[%s4007_s1 + $0x168] sm:$0xff]   ;;  %v3061_v48 = vld [vmem:[%s4007_s1 + $0x160] sm:$0xff]  }
  0x10   :  { %2695 = vmatprep.subr.bf16.mxu0 %v3027_v16  ;;  %v3055_v42 = vld [vmem:[%s4007_s1 + $0x1f0] sm:$0xff]   ;;  %v3058_v45 = vld [vmem:[%s4007_s1 + $0x128] sm:$0xff]   ;;  %v3062_v49 = vld [vmem:[%s4007_s1 + $0x120] sm:$0xff]  }
  0x11   :  { %2716 = vmatpush3.bf16.msra.mxu1 %v3026_v15  ;;  %v3056_v43 = vld [vmem:[%s4007_s1 + $0x1b0] sm:$0xff]   ;;  %v3059_v46 = vld [vmem:[%s4007_s1 + $0x1e8] sm:$0xff]   ;;  %v3063_v50 = vld [vmem:[%s4007_s1 + $0x1e0] sm:$0xff]  }
  0x12   :  { %2717 = vmatprep.subr.bf16.mxu1 %v3029_v18  ;;  %v3060_v47 = vld [vmem:[%s4007_s1 + $0x1a8] sm:$0xff]   ;;  %v3064_v51 = vld [vmem:[%s4007_s1 + $0x1a0] sm:$0xff]   ;;  %v3066_v53 = vld [vmem:[%s4007_s1 + $0x118] sm:$0xff]  }
  0x13   :  { %2696 = vmatpush3.bf16.msra.mxu0 %v3028_v17  ;;  %v3067_v54 = vld [vmem:[%s4007_s1 + $0x1d8] sm:$0xff]   ;;  %v3069_v56 = vld [vmem:[%s4007_s1 + $0x150] sm:$0xff]   ;;  %v3073_v60 = vld [vmem:[%s4007_s1 + $0x148] sm:$0xff]  }
  0x14   :  { %2697 = vmatprep.subr.bf16.mxu0 %v3031_v20  ;;  %v3068_v55 = vld [vmem:[%s4007_s1 + $0x198] sm:$0xff]   ;;  %v3070_v57 = vld [vmem:[%s4007_s1 + $0x110] sm:$0xff]   ;;  %v3074_v61 = vld [vmem:[%s4007_s1 + $0x108] sm:$0xff]  }
  0x15   :  { %2718 = vmatpush3.bf16.msra.mxu1 %v3030_v19  ;;  %v3071_v58 = vld [vmem:[%s4007_s1 + $0x1d0] sm:$0xff]   ;;  %v3075_v62 = vld [vmem:[%s4007_s1 + $0x1c8] sm:$0xff]   ;;  %v3077_v0 = vld [vmem:[%s4007_s1 + $0x140] sm:$0xff]  }
  0x16   :  { %2719 = vmatprep.subr.bf16.mxu1 %v3033_v22  ;;  %v3072_v59 = vld [vmem:[%s4007_s1 + $0x190] sm:$0xff]   ;;  %v3076_v63 = vld [vmem:[%s4007_s1 + $0x188] sm:$0xff]   ;;  %v3078_v1 = vld [vmem:[%s4007_s1 + $0x100] sm:$0xff]  }
  0x17   :  { %2698 = vmatpush3.bf16.msra.mxu0 %v3032_v21  ;;  %v3079_v2 = vld [vmem:[%s4007_s1 + $0x1c0] sm:$0xff]   ;;  %v3080_v3 = vld [vmem:[%s4008_s0 + $0x10] ss:$100 sps:$4 sm:$0xff]   ;;  %v3084_v6 = vld [vmem:[%s4007_s1 + $0x278] sm:$0xff]  }
  0x18   :  { %2699 = vmatprep.subr.bf16.mxu0 %v3035_v24  ;;  %v3082_v4 = vld [vmem:[%s4008_s0 + $0x14] ss:$100 sps:$4 sm:$0xff]   ;;  %v3083_v5 = vld [vmem:[%s4007_s1 + $0x180] sm:$0xff]   ;;  %v3095_v16 = vld [vmem:[%s4007_s1 + $0x268] sm:$0xff]  }
  0x19   :  { %2720 = vmatpush3.bf16.msra.mxu1 %v3034_v23  ;;  %v3085_v7 = vld [vmem:[%s4008_s0 + $0x18] ss:$100 sps:$4 sm:$0xff]   ;;  %v3091_v12 = vld [vmem:[%s4007_s1 + $0x270] sm:$0xff]   ;;  %v3096_v17 = vld [vmem:[%s4007_s1 + $0x228] sm:$0xff]  }
  0x1a   :  { %2721 = vmatprep.subr.bf16.mxu1 %v3037_v26  ;;  %v3087_v8 = vld [vmem:[%s4008_s0 + $0x1c] ss:$100 sps:$4 sm:$0xff]   ;;  %v3092_v13 = vld [vmem:[%s4007_s1 + $0x230] sm:$0xff]   ;;  %v3097_v18 = vld [vmem:[%s4007_s1 + $0x2e8] sm:$0xff]  }
  0x1b   :  { %2700 = vmatpush3.bf16.msra.mxu0 %v3036_v25  ;;  %v3088_v9 = vld [vmem:[%s4007_s1 + $0x238] sm:$0xff]   ;;  %v3093_v14 = vld [vmem:[%s4007_s1 + $0x2f0] sm:$0xff]   ;;  %v3098_v19 = vld [vmem:[%s4007_s1 + $0x2a8] sm:$0xff]  }
  0x1c   :  { %2701 = vmatprep.subr.bf16.mxu0 %v3039_v28  ;;  %v3089_v10 = vld [vmem:[%s4007_s1 + $0x2f8] sm:$0xff]   ;;  %v3094_v15 = vld [vmem:[%s4007_s1 + $0x2b0] sm:$0xff]   ;;  %v3099_v20 = vld [vmem:[%s4007_s1 + $0x260] sm:$0xff]  }
  0x1d   :  { %2722 = vmatpush3.bf16.msra.mxu1 %v3038_v27  ;;  %v3090_v11 = vld [vmem:[%s4007_s1 + $0x2b8] sm:$0xff]   ;;  %v3100_v21 = vld [vmem:[%s4007_s1 + $0x220] sm:$0xff]   ;;  %v3107_v28 = vld [vmem:[%s4007_s1 + $0x250] sm:$0xff]  }
  0x1e   :  { %2723 = vmatprep.subr.bf16.mxu1 %v3041_v30  ;;  %v3101_v22 = vld [vmem:[%s4007_s1 + $0x2e0] sm:$0xff]   ;;  %v3103_v24 = vld [vmem:[%s4007_s1 + $0x258] sm:$0xff]   ;;  %v3109_v30 = vld [vmem:[%s4007_s1 + $0x2d0] sm:$0xff]  }
  0x1f   :  { %2702 = vmatpush3.bf16.msra.mxu0 %v3040_v29  ;;  %v3102_v23 = vld [vmem:[%s4007_s1 + $0x2a0] sm:$0xff]   ;;  %v3104_v25 = vld [vmem:[%s4007_s1 + $0x218] sm:$0xff]   ;;  %v3108_v29 = vld [vmem:[%s4007_s1 + $0x210] sm:$0xff]  }
  0x20   :  { %2731 = vmatprep.subr.bf16.mxu0 %v3046_v34  ;;  %v3105_v26 = vld [vmem:[%s4007_s1 + $0x2d8] sm:$0xff]   ;;  %v3111_v32 = vld [vmem:[%s4007_s1 + $0x248] sm:$0xff]   ;;  %v3115_v36 = vld [vmem:[%s4007_s1 + $0x240] sm:$0xff]  }
  0x21   :  { %2724 = vmatpush3.bf16.msra.mxu1 %v3045_v33  ;;  %v3106_v27 = vld [vmem:[%s4007_s1 + $0x298] sm:$0xff]   ;;  %v3112_v33 = vld [vmem:[%s4007_s1 + $0x208] sm:$0xff]  }
  0x22   :  { %1813 = vmatmul.mubr.bf16.vlgmr.msra.gmra.mxu0 %v3042_v31  ;;  %2753 = vmatprep.subr.bf16.mxu1 %v3051_v38  ;;  %v3110_v31 = vld [vmem:[%s4007_s1 + $0x290] sm:$0xff]   ;;  %v3113_v34 = vld [vmem:[%s4007_s1 + $0x2c8] sm:$0xff]   ;;  %v3117_v38 = vld [vmem:[%s4007_s1 + $0x2c0] sm:$0xff]  }
  0x23   :  { %2732 = vmatpush3.bf16.msra.mxu0 %v3050_v37  ;;  %1894 = vmatprep.mubr.bf16.mxu0 %v3082_v4  ;;  %v3116_v37 = vld [vmem:[%s4007_s1 + $0x200] sm:$0xff]   ;;  %v3149_v4 = vld [vmem:[%s4007_s1 + $0x348] sm:$0xff]  }
  0x24   :  { %1854 = vmatmul.mubr.bf16.vlgmr.msra.gmra.mxu1 %v3047_v35  ;;  %2733 = vmatprep.subr.bf16.mxu0 %v3053_v40  ;;  %v3114_v35 = vld [vmem:[%s4007_s1 + $0x288] sm:$0xff]  }
  0x25   :  { %2754 = vmatpush3.bf16.msra.mxu1 %v3052_v39  ;;  %1935 = vmatprep.mubr.bf16.mxu1 %v3087_v8  ;;  %v3118_v39 = vld [vmem:[%s4008_s0 + $0x20] ss:$100 sps:$4 sm:$0xff]  }
  0x26   :  { %2755 = vmatprep.subr.bf16.mxu1 %v3055_v42  ;;  %v3120_v40 = vld [vmem:[%s4008_s0 + $0x24] ss:$100 sps:$4 sm:$0xff]   ;;  %v3122_v42 = vld [vmem:[%s4007_s1 + $0x378] sm:$0xff]  }
  0x27   :  { %2734 = vmatpush3.bf16.msra.mxu0 %v3054_v41  ;;  %v3121_v41 = vld [vmem:[%s4007_s1 + $0x280] sm:$0xff]  }
  0x28   :  { %2735 = vmatprep.subr.bf16.mxu0 %v3057_v44  ;;  %v3125_v44 = vld [vmem:[%s4008_s0 + $0x2c] ss:$100 sps:$4 sm:$0xff]   ;;  %v3153_v8 = vld [vmem:[%s4007_s1 + $0x340] sm:$0xff]  }
  0x29   :  { %2756 = vmatpush3.bf16.msra.mxu1 %v3056_v43  ;;  %v3123_v43 = vld [vmem:[%s4008_s0 + $0x28] ss:$100 sps:$4 sm:$0xff]  }
  0x2a   :  { %2757 = vmatprep.subr.bf16.mxu1 %v3059_v46  ;;  %v3127_v46 = vld [vmem:[%s4007_s1 + $0x3f8] sm:$0xff]  }
  0x2b   :  { %2736 = vmatpush3.bf16.msra.mxu0 %v3058_v45  ;;  %v3126_v45 = vld [vmem:[%s4007_s1 + $0x338] sm:$0xff]  }
  0x2c   :  { %2737 = vmatprep.subr.bf16.mxu0 %v3061_v48  ;;  %v3129_v48 = vld [vmem:[%s4007_s1 + $0x370] sm:$0xff]  }
  0x2d   :  { %2758 = vmatpush3.bf16.msra.mxu1 %v3060_v47  ;;  %v3128_v47 = vld [vmem:[%s4007_s1 + $0x3b8] sm:$0xff]  }
  0x2e   :  { %2759 = vmatprep.subr.bf16.mxu1 %v3063_v50  ;;  %v3131_v50 = vld [vmem:[%s4007_s1 + $0x3f0] sm:$0xff]  }
  0x2f   :  { %2738 = vmatpush3.bf16.msra.mxu0 %v3062_v49  ;;  %v3130_v49 = vld [vmem:[%s4007_s1 + $0x330] sm:$0xff]  }
  0x30   :  { %2739 = vmatprep.subr.bf16.mxu0 %v3065_v52  ;;  %v3133_v52 = vld [vmem:[%s4007_s1 + $0x368] sm:$0xff]  }
  0x31   :  { %2760 = vmatpush3.bf16.msra.mxu1 %v3064_v51  ;;  %v3132_v51 = vld [vmem:[%s4007_s1 + $0x3b0] sm:$0xff]  }
  0x32   :  { %2761 = vmatprep.subr.bf16.mxu1 %v3067_v54  ;;  %v3135_v54 = vld [vmem:[%s4007_s1 + $0x3e8] sm:$0xff]  }
  0x33   :  { %2740 = vmatpush3.bf16.msra.mxu0 %v3066_v53  ;;  %v3134_v53 = vld [vmem:[%s4007_s1 + $0x328] sm:$0xff]  }
  0x34   :  { %2741 = vmatprep.subr.bf16.mxu0 %v3069_v56  ;;  %v3137_v56 = vld [vmem:[%s4007_s1 + $0x360] sm:$0xff]  }
  0x35   :  { %2762 = vmatpush3.bf16.msra.mxu1 %v3068_v55  ;;  %v3136_v55 = vld [vmem:[%s4007_s1 + $0x3a8] sm:$0xff]  }
  0x36   :  { %2763 = vmatprep.subr.bf16.mxu1 %v3071_v58  ;;  %v3139_v58 = vld [vmem:[%s4007_s1 + $0x3e0] sm:$0xff]  }
  0x37   :  { %2742 = vmatpush3.bf16.msra.mxu0 %v3070_v57  ;;  %v3138_v57 = vld [vmem:[%s4007_s1 + $0x320] sm:$0xff]  }
  0x38   :  { %2743 = vmatprep.subr.bf16.mxu0 %v3073_v60  ;;  %v3141_v60 = vld [vmem:[%s4007_s1 + $0x358] sm:$0xff]  }
  0x39   :  { %2764 = vmatpush3.bf16.msra.mxu1 %v3072_v59  ;;  %v3140_v59 = vld [vmem:[%s4007_s1 + $0x3a0] sm:$0xff]  }
  0x3a   :  { %2765 = vmatprep.subr.bf16.mxu1 %v3075_v62  ;;  %v3143_v62 = vld [vmem:[%s4007_s1 + $0x3d8] sm:$0xff]  }
  0x3b   :  { %2744 = vmatpush3.bf16.msra.mxu0 %v3074_v61  ;;  %v3142_v61 = vld [vmem:[%s4007_s1 + $0x318] sm:$0xff]  }
  0x3c   :  { %2745 = vmatprep.subr.bf16.mxu0 %v3077_v0  ;;  %v3145_v0 = vld [vmem:[%s4007_s1 + $0x350] sm:$0xff]  }
  0x3d   :  { %2766 = vmatpush3.bf16.msra.mxu1 %v3076_v63  ;;  %v3144_v63 = vld [vmem:[%s4007_s1 + $0x398] sm:$0xff]  }
  0x3e   :  { %2767 = vmatprep.subr.bf16.mxu1 %v3079_v2  ;;  %v3147_v2 = vld [vmem:[%s4007_s1 + $0x3d0] sm:$0xff]  }
  0x3f   :  { %2746 = vmatpush3.bf16.msra.mxu0 %v3078_v1  ;;  %v3146_v1 = vld [vmem:[%s4007_s1 + $0x310] sm:$0xff]  }
  0x40   :  { %2775 = vmatprep.subr.bf16.mxu0 %v3084_v6  ;;  %v3151_v6 = vld [vmem:[%s4007_s1 + $0x3c8] sm:$0xff]  }
  0x41   :  { %2768 = vmatpush3.bf16.msra.mxu1 %v3083_v5  ;;  %v3150_v5 = vld [vmem:[%s4007_s1 + $0x308] sm:$0xff]  }
  0x42   :  { %1895 = vmatmul.mubr.bf16.vlgmr.msra.gmra.mxu0 %v3080_v3  ;;  %2797 = vmatprep.subr.bf16.mxu1 %v3089_v10  ;;  %v3148_v3 = vld [vmem:[%s4007_s1 + $0x390] sm:$0xff]   ;;  %v3155_v10 = vld [vmem:[%s4007_s1 + $0x3c0] sm:$0xff]  }
  0x43   :  { %2776 = vmatpush3.bf16.msra.mxu0 %v3088_v9  ;;  %1976 = vmatprep.mubr.bf16.mxu0 %v3120_v40  ;;  %v3154_v9 = vld [vmem:[%s4007_s1 + $0x300] sm:$0xff]   ;;  %v3187_v40 = vld [vmem:[%s4007_s1 + $0x448] sm:$0xff]  }
  0x44   :  { %1936 = vmatmul.mubr.bf16.vlgmr.msra.gmra.mxu1 %v3085_v7  ;;  %2777 = vmatprep.subr.bf16.mxu0 %v3091_v12  ;;  %v3152_v7 = vld [vmem:[%s4007_s1 + $0x388] sm:$0xff]   ;;  %v3158_v12 = vld [vmem:[%s4008_s0 + $0x34] ss:$100 sps:$4 sm:$0xff]  }
  0x45   :  { %2798 = vmatpush3.bf16.msra.mxu1 %v3090_v11  ;;  %2017 = vmatprep.mubr.bf16.mxu1 %v3125_v44  ;;  %v3156_v11 = vld [vmem:[%s4008_s0 + $0x30] ss:$100 sps:$4 sm:$0xff]   ;;  %v3191_v44 = vld [vmem:[%s4007_s1 + $0x440] sm:$0xff]  }
  0x46   :  { %2799 = vmatprep.subr.bf16.mxu1 %v3093_v14  ;;  %v3160_v14 = vld [vmem:[%s4007_s1 + $0x478] sm:$0xff]  }
  0x47   :  { %2778 = vmatpush3.bf16.msra.mxu0 %v3092_v13  ;;  %v3159_v13 = vld [vmem:[%s4007_s1 + $0x380] sm:$0xff]  }
  0x48   :  { %2779 = vmatprep.subr.bf16.mxu0 %v3095_v16  ;;  %v3163_v16 = vld [vmem:[%s4008_s0 + $0x3c] ss:$100 sps:$4 sm:$0xff]  }
  0x49   :  { %2800 = vmatpush3.bf16.msra.mxu1 %v3094_v15  ;;  %v3161_v15 = vld [vmem:[%s4008_s0 + $0x38] ss:$100 sps:$4 sm:$0xff]  }
  0x4a   :  { %2801 = vmatprep.subr.bf16.mxu1 %v3097_v18  ;;  %v3165_v18 = vld [vmem:[%s4007_s1 + $0x4f8] sm:$0xff]  }
  0x4b   :  { %2780 = vmatpush3.bf16.msra.mxu0 %v3096_v17  ;;  %v3164_v17 = vld [vmem:[%s4007_s1 + $0x438] sm:$0xff]  }
  0x4c   :  { %2781 = vmatprep.subr.bf16.mxu0 %v3099_v20  ;;  %v3167_v20 = vld [vmem:[%s4007_s1 + $0x470] sm:$0xff]  }
  0x4d   :  { %2802 = vmatpush3.bf16.msra.mxu1 %v3098_v19  ;;  %v3166_v19 = vld [vmem:[%s4007_s1 + $0x4b8] sm:$0xff]  }
  0x4e   :  { %2803 = vmatprep.subr.bf16.mxu1 %v3101_v22  ;;  %v3169_v22 = vld [vmem:[%s4007_s1 + $0x4f0] sm:$0xff]  }
  0x4f   :  { %2782 = vmatpush3.bf16.msra.mxu0 %v3100_v21  ;;  %v3168_v21 = vld [vmem:[%s4007_s1 + $0x430] sm:$0xff]  }
  0x50   :  { %2783 = vmatprep.subr.bf16.mxu0 %v3103_v24  ;;  %v3171_v24 = vld [vmem:[%s4007_s1 + $0x468] sm:$0xff]  }
  0x51   :  { %2804 = vmatpush3.bf16.msra.mxu1 %v3102_v23  ;;  %v3170_v23 = vld [vmem:[%s4007_s1 + $0x4b0] sm:$0xff]  }
  0x52   :  { %2805 = vmatprep.subr.bf16.mxu1 %v3105_v26  ;;  %v3173_v26 = vld [vmem:[%s4007_s1 + $0x4e8] sm:$0xff]  }
  0x53   :  { %2784 = vmatpush3.bf16.msra.mxu0 %v3104_v25  ;;  %v3172_v25 = vld [vmem:[%s4007_s1 + $0x428] sm:$0xff]  }
  0x54   :  { %2785 = vmatprep.subr.bf16.mxu0 %v3107_v28  ;;  %v3175_v28 = vld [vmem:[%s4007_s1 + $0x460] sm:$0xff]  }
  0x55   :  { %2806 = vmatpush3.bf16.msra.mxu1 %v3106_v27  ;;  %v3174_v27 = vld [vmem:[%s4007_s1 + $0x4a8] sm:$0xff]  }
  0x56   :  { %2807 = vmatprep.subr.bf16.mxu1 %v3109_v30  ;;  %v3177_v30 = vld [vmem:[%s4007_s1 + $0x4e0] sm:$0xff]  }
  0x57   :  { %2786 = vmatpush3.bf16.msra.mxu0 %v3108_v29  ;;  %v3176_v29 = vld [vmem:[%s4007_s1 + $0x420] sm:$0xff]  }
  0x58   :  { %2787 = vmatprep.subr.bf16.mxu0 %v3111_v32  ;;  %v3179_v32 = vld [vmem:[%s4007_s1 + $0x458] sm:$0xff]  }
  0x59   :  { %2808 = vmatpush3.bf16.msra.mxu1 %v3110_v31  ;;  %v3178_v31 = vld [vmem:[%s4007_s1 + $0x4a0] sm:$0xff]  }
  0x5a   :  { %2809 = vmatprep.subr.bf16.mxu1 %v3113_v34  ;;  %v3181_v34 = vld [vmem:[%s4007_s1 + $0x4d8] sm:$0xff]  }
  0x5b   :  { %2788 = vmatpush3.bf16.msra.mxu0 %v3112_v33  ;;  %v3180_v33 = vld [vmem:[%s4007_s1 + $0x418] sm:$0xff]  }
  0x5c   :  { %2789 = vmatprep.subr.bf16.mxu0 %v3115_v36  ;;  %v3183_v36 = vld [vmem:[%s4007_s1 + $0x450] sm:$0xff]  }
  0x5d   :  { %2810 = vmatpush3.bf16.msra.mxu1 %v3114_v35  ;;  %v3182_v35 = vld [vmem:[%s4007_s1 + $0x498] sm:$0xff]  }
  0x5e   :  { %2811 = vmatprep.subr.bf16.mxu1 %v3117_v38  ;;  %v3185_v38 = vld [vmem:[%s4007_s1 + $0x4d0] sm:$0xff]  }
  0x5f   :  { %2790 = vmatpush3.bf16.msra.mxu0 %v3116_v37  ;;  %v3184_v37 = vld [vmem:[%s4007_s1 + $0x410] sm:$0xff]  }
  0x60   :  { %2819 = vmatprep.subr.bf16.mxu0 %v3122_v42  ;;  %v3189_v42 = vld [vmem:[%s4007_s1 + $0x4c8] sm:$0xff]  }
  0x61   :  { %2812 = vmatpush3.bf16.msra.mxu1 %v3121_v41  ;;  %v3188_v41 = vld [vmem:[%s4007_s1 + $0x408] sm:$0xff]  }
  0x62   :  { %1977 = vmatmul.mubr.bf16.vlgmr.msra.gmra.mxu0 %v3118_v39  ;;  %2841 = vmatprep.subr.bf16.mxu1 %v3127_v46  ;;  %v3186_v39 = vld [vmem:[%s4007_s1 + $0x490] sm:$0xff]   ;;  %v3193_v46 = vld [vmem:[%s4007_s1 + $0x4c0] sm:$0xff]  }
  0x63   :  { %2820 = vmatpush3.bf16.msra.mxu0 %v3126_v45  ;;  %2058 = vmatprep.mubr.bf16.mxu0 %v3158_v12  ;;  %v3192_v45 = vld [vmem:[%s4007_s1 + $0x400] sm:$0xff]   ;;  %v3225_v12 = vld [vmem:[%s4007_s1 + $0x548] sm:$0xff]  }
  0x64   :  { %2018 = vmatmul.mubr.bf16.vlgmr.msra.gmra.mxu1 %v3123_v43  ;;  %2821 = vmatprep.subr.bf16.mxu0 %v3129_v48  ;;  %v3190_v43 = vld [vmem:[%s4007_s1 + $0x488] sm:$0xff]  }
  0x65   :  { %2842 = vmatpush3.bf16.msra.mxu1 %v3128_v47  ;;  %2099 = vmatprep.mubr.bf16.mxu1 %v3163_v16  ;;  %v3194_v47 = vld [vmem:[%s4008_s0 + $0x40] ss:$100 sps:$4 sm:$0xff]  }
  0x66   :  { %2843 = vmatprep.subr.bf16.mxu1 %v3131_v50  ;;  %v3196_v48 = vld [vmem:[%s4008_s0 + $0x44] ss:$100 sps:$4 sm:$0xff]   ;;  %v3198_v50 = vld [vmem:[%s4007_s1 + $0x578] sm:$0xff]  }
  0x67   :  { %2822 = vmatpush3.bf16.msra.mxu0 %v3130_v49  ;;  %v3197_v49 = vld [vmem:[%s4007_s1 + $0x480] sm:$0xff]  }
  0x68   :  { %2823 = vmatprep.subr.bf16.mxu0 %v3133_v52  ;;  %v3201_v52 = vld [vmem:[%s4008_s0 + $0x4c] ss:$100 sps:$4 sm:$0xff]   ;;  %v3229_v16 = vld [vmem:[%s4007_s1 + $0x540] sm:$0xff]  }
  0x69   :  { %2844 = vmatpush3.bf16.msra.mxu1 %v3132_v51  ;;  %v3199_v51 = vld [vmem:[%s4008_s0 + $0x48] ss:$100 sps:$4 sm:$0xff]  }
  0x6a   :  { %2845 = vmatprep.subr.bf16.mxu1 %v3135_v54  ;;  %v3203_v54 = vld [vmem:[%s4007_s1 + $0x5f8] sm:$0xff]  }
  0x6b   :  { %2824 = vmatpush3.bf16.msra.mxu0 %v3134_v53  ;;  %v3202_v53 = vld [vmem:[%s4007_s1 + $0x538] sm:$0xff]  }
  0x6c   :  { %2825 = vmatprep.subr.bf16.mxu0 %v3137_v56  ;;  %v3205_v56 = vld [vmem:[%s4007_s1 + $0x570] sm:$0xff]  }
  0x6d   :  { %2846 = vmatpush3.bf16.msra.mxu1 %v3136_v55  ;;  %v3204_v55 = vld [vmem:[%s4007_s1 + $0x5b8] sm:$0xff]  }
  0x6e   :  { %2847 = vmatprep.subr.bf16.mxu1 %v3139_v58  ;;  %v3207_v58 = vld [vmem:[%s4007_s1 + $0x5f0] sm:$0xff]  }
  0x6f   :  { %2826 = vmatpush3.bf16.msra.mxu0 %v3138_v57  ;;  %v3206_v57 = vld [vmem:[%s4007_s1 + $0x530] sm:$0xff]  }
  0x70   :  { %2827 = vmatprep.subr.bf16.mxu0 %v3141_v60  ;;  %v3209_v60 = vld [vmem:[%s4007_s1 + $0x568] sm:$0xff]  }
  0x71   :  { %2848 = vmatpush3.bf16.msra.mxu1 %v3140_v59  ;;  %v3208_v59 = vld [vmem:[%s4007_s1 + $0x5b0] sm:$0xff]  }
  0x72   :  { %2849 = vmatprep.subr.bf16.mxu1 %v3143_v62  ;;  %v3211_v62 = vld [vmem:[%s4007_s1 + $0x5e8] sm:$0xff]  }
  0x73   :  { %2828 = vmatpush3.bf16.msra.mxu0 %v3142_v61  ;;  %v3210_v61 = vld [vmem:[%s4007_s1 + $0x528] sm:$0xff]  }
  0x74   :  { %2829 = vmatprep.subr.bf16.mxu0 %v3145_v0  ;;  %v3213_v0 = vld [vmem:[%s4007_s1 + $0x560] sm:$0xff]  }
  0x75   :  { %2850 = vmatpush3.bf16.msra.mxu1 %v3144_v63  ;;  %v3212_v63 = vld [vmem:[%s4007_s1 + $0x5a8] sm:$0xff]  }
  0x76   :  { %2851 = vmatprep.subr.bf16.mxu1 %v3147_v2  ;;  %v3215_v2 = vld [vmem:[%s4007_s1 + $0x5e0] sm:$0xff]  }
  0x77   :  { %2830 = vmatpush3.bf16.msra.mxu0 %v3146_v1  ;;  %v3214_v1 = vld [vmem:[%s4007_s1 + $0x520] sm:$0xff]  }
  0x78   :  { %2831 = vmatprep.subr.bf16.mxu0 %v3149_v4  ;;  %v3217_v4 = vld [vmem:[%s4007_s1 + $0x558] sm:$0xff]  }
  0x79   :  { %2852 = vmatpush3.bf16.msra.mxu1 %v3148_v3  ;;  %v3216_v3 = vld [vmem:[%s4007_s1 + $0x5a0] sm:$0xff]  }
  0x7a   :  { %2853 = vmatprep.subr.bf16.mxu1 %v3151_v6  ;;  %v3219_v6 = vld [vmem:[%s4007_s1 + $0x5d8] sm:$0xff]  }
  0x7b   :  { %2832 = vmatpush3.bf16.msra.mxu0 %v3150_v5  ;;  %v3218_v5 = vld [vmem:[%s4007_s1 + $0x518] sm:$0xff]  }
  0x7c   :  { %2833 = vmatprep.subr.bf16.mxu0 %v3153_v8  ;;  %v3221_v8 = vld [vmem:[%s4007_s1 + $0x550] sm:$0xff]  }
  0x7d   :  { %2854 = vmatpush3.bf16.msra.mxu1 %v3152_v7  ;;  %v3220_v7 = vld [vmem:[%s4007_s1 + $0x598] sm:$0xff]  }
  0x7e   :  { %2855 = vmatprep.subr.bf16.mxu1 %v3155_v10  ;;  %v3223_v10 = vld [vmem:[%s4007_s1 + $0x5d0] sm:$0xff]  }
  0x7f   :  { %2834 = vmatpush3.bf16.msra.mxu0 %v3154_v9  ;;  %v3222_v9 = vld [vmem:[%s4007_s1 + $0x510] sm:$0xff]  }
  0x80   :  { %2863 = vmatprep.subr.bf16.mxu0 %v3160_v14  ;;  %v3227_v14 = vld [vmem:[%s4007_s1 + $0x5c8] sm:$0xff]  }
  0x81   :  { %2856 = vmatpush3.bf16.msra.mxu1 %v3159_v13  ;;  %v3226_v13 = vld [vmem:[%s4007_s1 + $0x508] sm:$0xff]  }
  0x82   :  { %2059 = vmatmul.mubr.bf16.vlgmr.msra.gmra.mxu0 %v3156_v11  ;;  %2885 = vmatprep.subr.bf16.mxu1 %v3165_v18  ;;  %v3224_v11 = vld [vmem:[%s4007_s1 + $0x590] sm:$0xff]   ;;  %v3231_v18 = vld [vmem:[%s4007_s1 + $0x5c0] sm:$0xff]  }
  0x83   :  { %2864 = vmatpush3.bf16.msra.mxu0 %v3164_v17  ;;  %2140 = vmatprep.mubr.bf16.mxu0 %v3196_v48  ;;  %v3230_v17 = vld [vmem:[%s4007_s1 + $0x500] sm:$0xff]  }
  0x84   :  { %2100 = vmatmul.mubr.bf16.vlgmr.msra.gmra.mxu1 %v3161_v15  ;;  %2865 = vmatprep.subr.bf16.mxu0 %v3167_v20  ;;  %v3228_v15 = vld [vmem:[%s4007_s1 + $0x588] sm:$0xff]   ;;  %v3234_v20 = vld [vmem:[%s4008_s0 + $0x54] ss:$100 sps:$4 sm:$0xff]  }
  0x85   :  { %2886 = vmatpush3.bf16.msra.mxu1 %v3166_v19  ;;  %2181 = vmatprep.mubr.bf16.mxu1 %v3201_v52  ;;  %v3232_v19 = vld [vmem:[%s4008_s0 + $0x50] ss:$100 sps:$4 sm:$0xff]  }
  0x86   :  { %2887 = vmatprep.subr.bf16.mxu1 %v3169_v22  ;;  %v3264_v22 = vmov 0.0  }
  0x87   :  { %2866 = vmatpush3.bf16.msra.mxu0 %v3168_v21  ;;  %v3235_v21 = vld [vmem:[%s4007_s1 + $0x580] sm:$0xff]  }
  0x88   :  { %2867 = vmatprep.subr.bf16.mxu0 %v3171_v24  ;;  %v3238_v24 = vld [vmem:[%s4008_s0 + $0x5c] ss:$100 sps:$4 sm:$0xff]  }
  0x89   :  { %2888 = vmatpush3.bf16.msra.mxu1 %v3170_v23  ;;  %v3236_v23 = vld [vmem:[%s4008_s0 + $0x58] ss:$100 sps:$4 sm:$0xff]  }
  0x8a   :  { %2889 = vmatprep.subr.bf16.mxu1 %v3173_v26  ;;  %v3240_v26 = vld [vmem:[%s4007_s1 + $0x630] sm:$0xff]  }
  0x8b   :  { %2868 = vmatpush3.bf16.msra.mxu0 %v3172_v25  ;;  %v3239_v25 = vld [vmem:[%s4007_s1 + $0x638] sm:$0xff]  }
  0x8c   :  { %2869 = vmatprep.subr.bf16.mxu0 %v3175_v28  ;;  %v3242_v28 = vld [vmem:[%s4007_s1 + $0x620] sm:$0xff]  }
  0x8d   :  { %2890 = vmatpush3.bf16.msra.mxu1 %v3174_v27  ;;  %v3241_v27 = vld [vmem:[%s4007_s1 + $0x628] sm:$0xff]  }
  0x8e   :  { %2891 = vmatprep.subr.bf16.mxu1 %v3177_v30  ;;  %v3244_v30 = vld [vmem:[%s4007_s1 + $0x610] sm:$0xff]  }
  0x8f   :  { %2870 = vmatpush3.bf16.msra.mxu0 %v3176_v29  ;;  %v3243_v29 = vld [vmem:[%s4007_s1 + $0x618] sm:$0xff]  }
  0x90   :  { %2871 = vmatprep.subr.bf16.mxu0 %v3179_v32  ;;  %v3246_v32 = vld [vmem:[%s4007_s1 + $0x600] sm:$0xff]  }
  0x91   :  { %2892 = vmatpush3.bf16.msra.mxu1 %v3178_v31  ;;  %v3245_v31 = vld [vmem:[%s4007_s1 + $0x608] sm:$0xff]  }
  0x92   :  { %2893 = vmatprep.subr.bf16.mxu1 %v3181_v34  ;;  %v3248_v34 = vld [vmem:[%s4009_s3 + $0x38] sm:$0xff]  }
  0x93   :  { %2872 = vmatpush3.bf16.msra.mxu0 %v3180_v33  ;;  %v3247_v33 = vld [vmem:[%s4008_s0 + $0x60] ss:$100 sps:$4 sm:$0xff]  }
  0x94   :  { %2873 = vmatprep.subr.bf16.mxu0 %v3183_v36  ;;  %v3250_v36 = vld [vmem:[%s4009_s3 + $0x28] sm:$0xff]  }
  0x95   :  { %2894 = vmatpush3.bf16.msra.mxu1 %v3182_v35  ;;  %v3249_v35 = vld [vmem:[%s4009_s3 + $0x30] sm:$0xff]  }
  0x96   :  { %2895 = vmatprep.subr.bf16.mxu1 %v3185_v38  ;;  %v3252_v38 = vld [vmem:[%s4009_s3 + $0x18] sm:$0xff]  }
  0x97   :  { %2874 = vmatpush3.bf16.msra.mxu0 %v3184_v37  ;;  %v3251_v37 = vld [vmem:[%s4009_s3 + $0x20] sm:$0xff]  }
  0x98   :  { %2875 = vmatprep.subr.bf16.mxu0 %v3187_v40  ;;  %v3254_v40 = vld [vmem:[%s4009_s3 + $0x8] sm:$0xff]  }
  0x99   :  { %2896 = vmatpush3.bf16.msra.mxu1 %v3186_v39  ;;  %v3253_v39 = vld [vmem:[%s4009_s3 + $0x10] sm:$0xff]  }
  0x9a   :  { %2897 = vmatprep.subr.bf16.mxu1 %v3189_v42 }
  0x9b   :  { %2876 = vmatpush3.bf16.msra.mxu0 %v3188_v41  ;;  %v3255_v41 = vld [vmem:[%s4009_s3] sm:$0xff]  }
  0x9c   :  { %2877 = vmatprep.subr.bf16.mxu0 %v3191_v44 }
  0x9d   :  { %2898 = vmatpush3.bf16.msra.mxu1 %v3190_v43 }
  0x9e   :  { %2899 = vmatprep.subr.bf16.mxu1 %v3193_v46 }
  0x9f   :  { %2878 = vmatpush3.bf16.msra.mxu0 %v3192_v45 }
  0xa0   :  { %2907 = vmatprep.subr.bf16.mxu0 %v3198_v50 }
  0xa1   :  { %2900 = vmatpush3.bf16.msra.mxu1 %v3197_v49 }
  0xa2   :  { %2141 = vmatmul.mubr.bf16.vlgmr.msra.gmra.mxu0 %v3194_v47  ;;  %2929 = vmatprep.subr.bf16.mxu1 %v3203_v54 }
  0xa3   :  { %2908 = vmatpush3.bf16.msra.mxu0 %v3202_v53  ;;  %2222 = vmatprep.mubr.bf16.mxu0 %v3234_v20 }
  0xa4   :  { %2182 = vmatmul.mubr.bf16.vlgmr.msra.gmra.mxu1 %v3199_v51  ;;  %2909 = vmatprep.subr.bf16.mxu0 %v3205_v56 }
  0xa5   :  { %2930 = vmatpush3.bf16.msra.mxu1 %v3204_v55  ;;  %2263 = vmatprep.mubr.bf16.mxu1 %v3238_v24 }
  0xa6   :  { %2931 = vmatprep.subr.bf16.mxu1 %v3207_v58 }
  0xa7   :  { %2910 = vmatpush3.bf16.msra.mxu0 %v3206_v57 }
  0xa8   :  { %2911 = vmatprep.subr.bf16.mxu0 %v3209_v60 }
  0xa9   :  { %2932 = vmatpush3.bf16.msra.mxu1 %v3208_v59 }
  0xaa   :  { %2933 = vmatprep.subr.bf16.mxu1 %v3211_v62 }
  0xab   :  { %2912 = vmatpush3.bf16.msra.mxu0 %v3210_v61 }
  0xac   :  { %2913 = vmatprep.subr.bf16.mxu0 %v3213_v0 }
  0xad   :  { %2934 = vmatpush3.bf16.msra.mxu1 %v3212_v63 }
  0xae   :  { %2935 = vmatprep.subr.bf16.mxu1 %v3215_v2 }
  0xaf   :  { %2914 = vmatpush3.bf16.msra.mxu0 %v3214_v1 }
  0xb0   :  { %2915 = vmatprep.subr.bf16.mxu0 %v3217_v4 }
  0xb1   :  { %2936 = vmatpush3.bf16.msra.mxu1 %v3216_v3 }
  0xb2   :  { %2937 = vmatprep.subr.bf16.mxu1 %v3219_v6 }
  0xb3   :  { %2916 = vmatpush3.bf16.msra.mxu0 %v3218_v5 }
  0xb4   :  { %2917 = vmatprep.subr.bf16.mxu0 %v3221_v8  ;;  %v2452_v8 = vld [vmem:[%s4010_s2] ss:$0 sm:$0xff] }
  0xb5   :  { %2938 = vmatpush3.bf16.msra.mxu1 %v3220_v7 }
  0xb6   :  { %2939 = vmatprep.subr.bf16.mxu1 %v3223_v10 }
  0xb7   :  { %2918 = vmatpush3.bf16.msra.mxu0 %v3222_v9 }
  0xb8   :  { %2919 = vmatprep.subr.bf16.mxu0 %v3225_v12 }
  0xb9   :  { %2940 = vmatpush3.bf16.msra.mxu1 %v3224_v11 }
  0xba   :  { %2941 = vmatprep.subr.bf16.mxu1 %v3227_v14 }
  0xbb   :  { %2920 = vmatpush3.bf16.msra.mxu0 %v3226_v13 }
  0xbc   :  { %2921 = vmatprep.subr.bf16.mxu0 %v3229_v16 }
  0xbd   :  { %2942 = vmatpush3.bf16.msra.mxu1 %v3228_v15 }
  0xbe   :  { %2943 = vmatprep.subr.bf16.mxu1 %v3231_v18 }
  0xbf   :  { %2922 = vmatpush3.bf16.msra.mxu0 %v3230_v17 }
  0xc0   :  { %2969 = vmatprep.subr.bf16.mxu0 %v3264_v22 }
  0xc1   :  { %2944 = vmatpush3.bf16.msra.mxu1 %v3235_v21 }
  0xc2   :  { %2223 = vmatmul.mubr.bf16.vlgmr.msra.gmra.mxu0 %v3232_v19  ;;  %2989 = vmatprep.subr.bf16.mxu1 %v3264_v22 }
  0xc3   :  { %2985 = vmatprep.mubr.msk.bf16.mxu0 %vm3265_vm0, %v3264_v22  ;;  %2970 = vmatpush3.bf16.msra.mxu0 %v3239_v25 }
  0xc4   :  { %2264 = vmatmul.mubr.bf16.vlgmr.msra.gmra.mxu1 %v3236_v23  ;;  %2971 = vmatprep.subr.bf16.mxu0 %v3264_v22 }
  0xc5   :  { %3005 = vmatprep.mubr.msk.bf16.mxu1 %vm3265_vm0, %v3264_v22  ;;  %2990 = vmatpush3.bf16.msra.mxu1 %v3248_v34 }
  0xc6   :  { %2991 = vmatprep.subr.bf16.mxu1 %v3264_v22 }
  0xc7   :  { %2972 = vmatpush3.bf16.msra.mxu0 %v3240_v26 }
  0xc8   :  { %2973 = vmatprep.subr.bf16.mxu0 %v3264_v22 }
  0xc9   :  { %2992 = vmatpush3.bf16.msra.mxu1 %v3249_v35 }
  0xca   :  { %2993 = vmatprep.subr.bf16.mxu1 %v3264_v22 }
  0xcb   :  { %2974 = vmatpush3.bf16.msra.mxu0 %v3241_v27 }
  0xcc   :  { %2975 = vmatprep.subr.bf16.mxu0 %v3264_v22 }
  0xcd   :  { %2994 = vmatpush3.bf16.msra.mxu1 %v3250_v36 }
  0xce   :  { %2995 = vmatprep.subr.bf16.mxu1 %v3264_v22 }
  0xcf   :  { %2976 = vmatpush3.bf16.msra.mxu0 %v3242_v28 }
  0xd0   :  { %2977 = vmatprep.subr.bf16.mxu0 %v3264_v22 }
  0xd1   :  { %2996 = vmatpush3.bf16.msra.mxu1 %v3251_v37 }
  0xd2   :  { %2997 = vmatprep.subr.bf16.mxu1 %v3264_v22 }
  0xd3   :  { %2978 = vmatpush3.bf16.msra.mxu0 %v3243_v29 }
  0xd4   :  { %2979 = vmatprep.subr.bf16.mxu0 %v3264_v22 }
  0xd5   :  { %2998 = vmatpush3.bf16.msra.mxu1 %v3252_v38 }
  0xd6   :  { %2999 = vmatprep.subr.bf16.mxu1 %v3264_v22 }
  0xd7   :  { %2980 = vmatpush3.bf16.msra.mxu0 %v3244_v30 }
  0xd8   :  { %2981 = vmatprep.subr.bf16.mxu0 %v3264_v22 }
  0xd9   :  { %3000 = vmatpush3.bf16.msra.mxu1 %v3253_v39 }
  0xda   :  { %3001 = vmatprep.subr.bf16.mxu1 %v3264_v22 }
  0xdb   :  { %2982 = vmatpush3.bf16.msra.mxu0 %v3245_v31 }
  0xdc   :  { %2983 = vmatprep.subr.bf16.mxu0 %v3264_v22 }
  0xdd   :  { %3002 = vmatpush3.bf16.msra.mxu1 %v3254_v40 }
  0xde   :  { %3003 = vmatprep.subr.bf16.mxu1 %v3264_v22 }
  0xdf   :  { %2984 = vmatpush3.bf16.msra.mxu0 %v3246_v32 }
  0xe1   :  { %3004 = vmatpush3.bf16.msra.mxu1 %v3255_v41 }
  0xe2   :  { %2986 = vmatmul.mubr.bf16.vlgmr.msra.gmra.mxu0 %v3247_v33  ;;  %v2703_v42 = vpop.f32.mrf.mxu0 }
  0xe4   :  { %v2704_v43 = vpop.f32.mrf.mxu0  ;;  %v2725_v44 = vpop.f32.mrf.mxu1 }
  0xe5   :  { %v2705_v7 = vadd.f32 %v2704_v43, %v2703_v42 }
  0xe6   :  { %v2706_v45 = vpop.f32.mrf.mxu0  ;;  %v2726_v46 = vpop.f32.mrf.mxu1 }
  0xe7   :  { %v1815_v13 = vadd.f32 %v2705_v7, %v2452_v8  ;;  %v2727_v14 = vadd.f32 %v2726_v46, %v2725_v44 }
  0xe8   :  { %v2707_v47 = vpop.f32.mrf.mxu0  ;;  %v2728_v48 = vpop.f32.mrf.mxu1 }
  0xe9   :  { %v2708_v11 = vadd.f32 %v2707_v47, %v2706_v45  ;;  %v1856_v21 = vadd.f32 %v2727_v14, %v1815_v13 }
  0xea   :  { %v2729_v50 = vpop.f32.mrf.mxu1 }
  0xeb   :  { %v1818_v16 = vadd.f32 %v2708_v11, %v2452_v8  ;;  %v2730_v17 = vadd.f32 %v2729_v50, %v2728_v48 }
  0xed   :  { %v1859_v23 = vadd.f32 %v2730_v17, %v1818_v16 }
 0x102   :  { %v2747_v49 = vpop.f32.mrf.mxu0 }
 0x104   :  { %v2748_v51 = vpop.f32.mrf.mxu0  ;;  %v2769_v52 = vpop.f32.mrf.mxu1 }
 0x105   :  { %v2749_v18 = vadd.f32 %v2748_v51, %v2747_v49 }
 0x106   :  { %v2750_v53 = vpop.f32.mrf.mxu0  ;;  %v2770_v54 = vpop.f32.mrf.mxu1 }
 0x107   :  { %v1897_v24 = vadd.f32 %v2749_v18, %v1856_v21  ;;  %v2771_v25 = vadd.f32 %v2770_v54, %v2769_v52 }
 0x108   :  { %v2751_v55 = vpop.f32.mrf.mxu0  ;;  %v2772_v56 = vpop.f32.mrf.mxu1 }
 0x109   :  { %v2752_v22 = vadd.f32 %v2751_v55, %v2750_v53  ;;  %v1938_v31 = vadd.f32 %v2771_v25, %v1897_v24 }
 0x10a   :  { %v2773_v58 = vpop.f32.mrf.mxu1 }
 0x10b   :  { %v1900_v28 = vadd.f32 %v2752_v22, %v1859_v23  ;;  %v2774_v29 = vadd.f32 %v2773_v58, %v2772_v56 }
 0x10d   :  { %v1941_v35 = vadd.f32 %v2774_v29, %v1900_v28 }
 0x122   :  { %v2791_v57 = vpop.f32.mrf.mxu0 }
 0x124   :  { %v2792_v59 = vpop.f32.mrf.mxu0  ;;  %v2813_v60 = vpop.f32.mrf.mxu1 }
 0x125   :  { %v2793_v30 = vadd.f32 %v2792_v59, %v2791_v57 }
 0x126   :  { %v2794_v61 = vpop.f32.mrf.mxu0  ;;  %v2814_v62 = vpop.f32.mrf.mxu1 }
 0x127   :  { %v1979_v36 = vadd.f32 %v2793_v30, %v1938_v31  ;;  %v2815_v37 = vadd.f32 %v2814_v62, %v2813_v60 }
 0x128   :  { %v2795_v63 = vpop.f32.mrf.mxu0  ;;  %v2816_v0 = vpop.f32.mrf.mxu1 }
 0x129   :  { %v2796_v32 = vadd.f32 %v2795_v63, %v2794_v61  ;;  %v2020_v43 = vadd.f32 %v2815_v37, %v1979_v36 }
 0x12a   :  { %v2817_v2 = vpop.f32.mrf.mxu1 }
 0x12b   :  { %v1982_v39 = vadd.f32 %v2796_v32, %v1941_v35  ;;  %v2818_v40 = vadd.f32 %v2817_v2, %v2816_v0 }
 0x12d   :  { %v2023_v47 = vadd.f32 %v2818_v40, %v1982_v39 }
 0x142   :  { %v2835_v1 = vpop.f32.mrf.mxu0 }
 0x144   :  { %v2836_v3 = vpop.f32.mrf.mxu0  ;;  %v2857_v4 = vpop.f32.mrf.mxu1 }
 0x145   :  { %v2837_v41 = vadd.f32 %v2836_v3, %v2835_v1 }
 0x146   :  { %v2838_v5 = vpop.f32.mrf.mxu0  ;;  %v2858_v6 = vpop.f32.mrf.mxu1 }
 0x147   :  { %v2061_v48 = vadd.f32 %v2837_v41, %v2020_v43  ;;  %v2859_v49 = vadd.f32 %v2858_v6, %v2857_v4 }
 0x148   :  { %v2839_v9 = vpop.f32.mrf.mxu0  ;;  %v2860_v10 = vpop.f32.mrf.mxu1 }
 0x149   :  { %v2840_v44 = vadd.f32 %v2839_v9, %v2838_v5  ;;  %v2102_v55 = vadd.f32 %v2859_v49, %v2061_v48 }
 0x14a   :  { %v2861_v15 = vpop.f32.mrf.mxu1 }
 0x14b   :  { %v2064_v50 = vadd.f32 %v2840_v44, %v2023_v47  ;;  %v2862_v51 = vadd.f32 %v2861_v15, %v2860_v10 }
 0x14d   :  { %v2105_v57 = vadd.f32 %v2862_v51, %v2064_v50 }
 0x162   :  { %v2879_v12 = vpop.f32.mrf.mxu0 }
 0x164   :  { %v2880_v19 = vpop.f32.mrf.mxu0  ;;  %v2901_v20 = vpop.f32.mrf.mxu1 }
 0x165   :  { %v2881_v52 = vadd.f32 %v2880_v19, %v2879_v12 }
 0x166   :  { %v2882_v26 = vpop.f32.mrf.mxu0  ;;  %v2902_v27 = vpop.f32.mrf.mxu1 }
 0x167   :  { %v2143_v58 = vadd.f32 %v2881_v52, %v2102_v55  ;;  %v2903_v59 = vadd.f32 %v2902_v27, %v2901_v20  ;;  %v2678_v20 = vld [vmem:[%s4011_s4] ss:$0 sm:$0xff] }
 0x168   :  { %v2883_v33 = vpop.f32.mrf.mxu0  ;;  %v2904_v34 = vpop.f32.mrf.mxu1 }
 0x169   :  { %v2884_v56 = vadd.f32 %v2883_v33, %v2882_v26  ;;  %v2184_v1 = vadd.f32 %v2903_v59, %v2143_v58 }
 0x16a   :  { %v2905_v42 = vpop.f32.mrf.mxu1 }
 0x16b   :  { %v2146_v62 = vadd.f32 %v2884_v56, %v2105_v57  ;;  %v2906_v63 = vadd.f32 %v2905_v42, %v2904_v34 }
 0x16d   :  { %v2187_v5 = vadd.f32 %v2906_v63, %v2146_v62 }
 0x182   :  { %v2923_v38 = vpop.f32.mrf.mxu0 }
 0x184   :  { %v2924_v45 = vpop.f32.mrf.mxu0  ;;  %v2945_v46 = vpop.f32.mrf.mxu1 }
 0x185   :  { %v2925_v0 = vadd.f32 %v2924_v45, %v2923_v38 }
 0x186   :  { %v2926_v53 = vpop.f32.mrf.mxu0  ;;  %v2946_v54 = vpop.f32.mrf.mxu1 }
 0x187   :  { %v2225_v4 = vadd.f32 %v2925_v0, %v2184_v1  ;;  %v2947_v6 = vadd.f32 %v2946_v54, %v2945_v46 }
 0x188   :  { %v2927_v60 = vpop.f32.mrf.mxu0  ;;  %v2948_v61 = vpop.f32.mrf.mxu1 }
 0x189   :  { %v2928_v2 = vadd.f32 %v2927_v60, %v2926_v53  ;;  %v2266_v10 = vadd.f32 %v2947_v6, %v2225_v4 }
 0x18a   :  { %v2949_v3 = vpop.f32.mrf.mxu1 }
 0x18b   :  { %v2228_v7 = vadd.f32 %v2928_v2, %v2187_v5  ;;  %v2950_v8 = vadd.f32 %v2949_v3, %v2948_v61 }
 0x18d   :  { %v2269_v13 = vadd.f32 %v2950_v8, %v2228_v7 }
 0x1a2   :  { %v2306_v9 = vpop.f32.mrf.mxu0 }
 0x1a3   :  { %v2307_v12 = vadd.f32 %v2306_v9, %v2266_v10 }
 0x1a4   :  { %v2987_v11 = vpop.f32.mrf.mxu0 }
 0x1a5   :  { %v2313_v17 = vmax.f32 %v2307_v12, 0.0 }
 0x1a6   :  { %v2309_v14 = vpop.f32.mrf.mxu0 }
 0x1a7   :  { %v2310_v15 = vadd.f32 %v2309_v14, %v2269_v13 }
 0x1a8   :  { %v2988_v16 = vpop.f32.mrf.mxu0 }
 0x1a9   :  { %v2314_v18 = vmax.f32 %v2310_v15, 0.0 }
 0x1ab   :  { %v2315_v19 = vpack.c.bf16 %v2314_v18, %v2313_v17 }
 0x1ad   :  { %3006 = vmatmul.mubr.bf16.vlgmr.msra.gmra.mxu1 %v2315_v19 }
 0x26d   :  { %v2421_v21 = vpop.f32.mrf.mxu1 }
 0x26e   :  { %v2422_v22 = vadd.f32 %v2678_v20, %v2421_v21 }
 0x26f   :  { %v3007_v23 = vpop.f32.mrf.mxu1 }
 0x270   :  { %2428 = vmax.xlane.f32.xlu0 %v2422_v22 }
 0x271   :  { %v2424_v24 = vpop.f32.mrf.mxu1 }
 0x272   :  { %v2425_v25 = vadd.f32 %v2678_v20, %v2424_v24 }
 0x273   :  { %v3008_v26 = vpop.f32.mrf.mxu1 }
 0x274   :  { %2430 = vmax.xlane.f32.xlu0 %v2425_v25 }
 0x2f9   :  { %v2429_v27 = vpop.xlane.xlu0 %2428 }
 0x2fa   :  { %v2432_v28 = vsub.f32 %v2422_v22, %v2429_v27 }
 0x2fc   :  { %v2434_v29 = vmul.f32 1.442695, %v2432_v28 }
 0x2fd   :  { %v2431_v30 = vpop.xlane.xlu0 %2430 }
 0x2fe   :  { %3256 = vpow2.f32 %v2434_v29  ;;  %v2433_v31 = vsub.f32 %v2425_v25, %v2431_v30 }
 0x300   :  { %v2436_v32 = vmul.f32 1.442695, %v2433_v31 }
 0x302   :  { %3258 = vpow2.f32 %v2436_v32 }
 0x30b   :  { %v3257_v33 = vpop.eup %3256 }
 0x30c   :  { %2438 = vadd.xlane.f32.xlu1 %v3257_v33 }
 0x30f   :  { %v3259_v34 = vpop.eup %3258 }
 0x310   :  { %2440 = vadd.xlane.f32.xlu1 %v3259_v34 }
 0x395   :  { %v2439_v35 = vpop.xlane.xlu1 %2438 }
 0x396   :  { %3260 = vrcp.f32 %v2439_v35 }
 0x399   :  { %v2441_v36 = vpop.xlane.xlu1 %2440 }
 0x39a   :  { %3262 = vrcp.f32 %v2441_v36 }
 0x3a3   :  { %v3261_v37 = vpop.eup %3260 }
 0x3a4   :  { %v2443_v38 = vmul.f32 %v3261_v37, %v3257_v33 }
 0x3a6   :  { %2446 = vst [vmem:[%s4012_s5] sm:$0xff] %v2443_v38 }
 0x3a7   :  { %v3263_v39 = vpop.eup %3262 }
 0x3a8   :  { %v2445_v40 = vmul.f32 %v3263_v39, %v3259_v34 }
 0x3aa   :  { %2447 = vst [vmem:[%s4012_s5 + $0x8] sm:$0xff] %v2445_v40 }

</bundles_post_ra>
